<compile_context>
chip_gen: v6e
topology: v6e:2x2x1
jax: 0.10.0
libtpu: 0.0.40
codegen_flags: <defaults>
</compile_context>

<pallas_src>
import functools

import jax
import jax.numpy as jnp
from jax.experimental import pallas as pl
from jax.experimental.pallas import tpu as pltpu


def _leaky(y, slope):
    # `slope` is a compile-time Python float (0.01 = LeakyReLU, 0.0 = ReLU),
    # so it lowers to a literal (no captured-constant issue).
    return jnp.where(y > 0, y, slope * y)


def _sigmoid(x):
    # Exact sigmoid (exp lowers to the EUP); keeps the 1e-3 tolerance safe.
    return 1.0 / (1.0 + jnp.exp(-x))


def _simple_rnn_kernel(*refs, num_layers, B, T, H, slope):
    # refs = [x, fc1_w, fc1_b, (wih, whh, b) * num_layers,
    #         fc_w, fc_b, fc2_w, fc2_b, out, seq_scratch]
    x_ref, fc1_w_ref, fc1_b_ref = refs[0], refs[1], refs[2]
    lstm_refs = refs[3:3 + 3 * num_layers]
    fc_w_ref, fc_b_ref, fc2_w_ref, fc2_b_ref = refs[3 + 3 * num_layers:
                                                    7 + 3 * num_layers]
    out_ref = refs[7 + 3 * num_layers]
    seq_scr = refs[8 + 3 * num_layers]

    # --- fc1 + LeakyReLU (rows are time-major t*B + b; order irrelevant) ---
    seq = _leaky(
        jnp.dot(x_ref[...], fc1_w_ref[...], preferred_element_type=jnp.float32)
        + fc1_b_ref[...], slope)                                  # (T*B, fc1)

    # --- stacked LSTM, h0 = c0 = 0.  Gate columns arrive as [i, f, o, g]. ---
    for layer in range(num_layers):
        wih_ref, whh_ref, b_ref = lstm_refs[3 * layer: 3 * layer + 3]
        # Hoisted input projection for ALL timesteps: one well-shaped matmul.
        gx = (jnp.dot(seq, wih_ref[...], preferred_element_type=jnp.float32)
              + b_ref[...])                                       # (T*B, 4H)
        whh = whh_ref[...]                                        # (H, 4H) hoisted
        h = jnp.zeros((B, H), jnp.float32)
        c = jnp.zeros((B, H), jnp.float32)
        for t in range(T):                                        # fully unrolled
            gates = gx[t * B:(t + 1) * B, :] + jnp.dot(
                h, whh, preferred_element_type=jnp.float32)       # (B, 4H)
            # One contiguous sigmoid over [i|f|o] and one tanh over [g].
            sig = _sigmoid(gates[:, 0:3 * H])
            i_g = sig[:, 0 * H:1 * H]
            f_g = sig[:, 1 * H:2 * H]
            o_g = sig[:, 2 * H:3 * H]
            g_g = jnp.tanh(gates[:, 3 * H:4 * H])
            c = f_g * c + i_g * g_g
            h = o_g * jnp.tanh(c)
            seq_scr[t * B:(t + 1) * B, :] = h                     # stays in VMEM
        seq = seq_scr[...]                                        # (T*B, H)
        # TODO(synk): inter-layer dropout (training only) intentionally omitted.

    # --- fc -> LeakyReLU -> fc2 ---
    y = _leaky(
        jnp.dot(seq, fc_w_ref[...], preferred_element_type=jnp.float32)
        + fc_b_ref[...], slope)
    y = (jnp.dot(y, fc2_w_ref[...], preferred_element_type=jnp.float32)
         + fc2_b_ref[...])
    out_ref[...] = y.astype(out_ref.dtype)


def _permute_gate_cols(w, H):
    # PyTorch gate order [i, f, g, o] -> kernel order [i, f, o, g] (columns).
    return jnp.concatenate(
        [w[:, 0:2 * H], w[:, 3 * H:4 * H], w[:, 2 * H:3 * H]], axis=-1)


# ----------------------------------------------------------------------------
# Wrapper: single fused pallas_call (no grid — everything fits in VMEM).
# ----------------------------------------------------------------------------
def simple_rnn_forward(params, x, *, is_leaky_relu=True):
    slope = 0.01 if is_leaky_relu else 0.0        # Python float -> literal
    B, T, F_in = x.shape
    num_layers = len(params["lstm"])
    H = params["lstm"][0][1].shape[0]
    out_size = params["fc2_w"].shape[1]

    # Time-major rows (row = t*B + b) so each step is a contiguous slice.
    x_tm = jnp.transpose(x, (1, 0, 2)).reshape(T * B, F_in)

    args = [x_tm, params["fc1_w"], params["fc1_b"]]
    for (wih_t, whh_t, bias) in params["lstm"]:
        # Tiny one-time column permute (fused by jit) so the kernel's serial
        # path uses contiguous sigmoid/tanh lane ranges.
        args += [_permute_gate_cols(wih_t, H),
                 _permute_gate_cols(whh_t, H),
                 _permute_gate_cols(bias, H)]
    args += [params["fc_w"], params["fc_b"], params["fc2_w"], params["fc2_b"]]

    kernel = functools.partial(
        _simple_rnn_kernel,
        num_layers=num_layers, B=B, T=T, H=H, slope=slope)

    y = pl.pallas_call(
        kernel,
        out_shape=jax.ShapeDtypeStruct((T * B, out_size), jnp.float32),
        in_specs=[pl.BlockSpec(memory_space=pltpu.MemorySpace.VMEM)] * len(args),
        out_specs=pl.BlockSpec(memory_space=pltpu.MemorySpace.VMEM),
        scratch_shapes=[pltpu.VMEM((T * B, H), jnp.float32)],
    )(*args)

    return y.reshape(T, B, out_size).transpose(1, 0, 2)           # (B, T, out)


# ----------------------------------------------------------------------------
# Deterministic parameter construction (shapes match the PyTorch module;
# weights stored pre-transposed as (in, out); biases as (1, out);
# LSTM gate columns in PyTorch order [i, f, g, o]).
# ----------------------------------------------------------------------------
def init_params(key, input_size, temporal_features, fc1_size, hidden_size,
                num_layers, output_size):
    def nrm(k, shape, scale=0.1):
        return scale * jax.random.normal(k, shape, dtype=jnp.float32)

    keys = jax.random.split(key, 6 + 4 * num_layers)
    in_feat = input_size + temporal_features
    p = {}
    p["fc1_w"] = nrm(keys[0], (in_feat, fc1_size))
    p["fc1_b"] = nrm(keys[1], (1, fc1_size))
    p["fc_w"] = nrm(keys[2], (hidden_size, 80))
    p["fc_b"] = nrm(keys[3], (1, 80))
    p["fc2_w"] = nrm(keys[4], (80, output_size))
    p["fc2_b"] = nrm(keys[5], (1, output_size))
    p["lstm"] = []
    for layer in range(num_layers):
        f_in = fc1_size if layer == 0 else hidden_size
        k0, k1, k2, k3 = keys[6 + 4 * layer: 10 + 4 * layer]
        wih_t = nrm(k0, (f_in, 4 * hidden_size))          # weight_ih_l{k}^T
        whh_t = nrm(k1, (hidden_size, 4 * hidden_size))   # weight_hh_l{k}^T
        bias = (nrm(k2, (4 * hidden_size,)) + nrm(k3, (4 * hidden_size,)))
        p["lstm"].append((wih_t, whh_t, bias.reshape(1, -1)))
    return p


# ----------------------------------------------------------------------------
# Pure-JAX reference (same math, PyTorch gate order) for a correctness check.
# ----------------------------------------------------------------------------
def simple_rnn_reference(params, x, *, is_leaky_relu=True):
    slope = 0.01 if is_leaky_relu else 0.0
    act = lambda v: jnp.where(v > 0, v, slope * v)
    B, T, _ = x.shape
    seq = act(x @ params["fc1_w"] + params["fc1_b"])              # (B, T, fc1)
    for (wih, whh, b) in params["lstm"]:
        Hs = whh.shape[0]
        hs = jnp.zeros((B, Hs), jnp.float32)
        cs = jnp.zeros((B, Hs), jnp.float32)
        outs = []
        for t in range(T):
            gates = seq[:, t, :] @ wih + hs @ whh + b
            i = jax.nn.sigmoid(gates[:, 0 * Hs:1 * Hs])
            f = jax.nn.sigmoid(gates[:, 1 * Hs:2 * Hs])
            g = jnp.tanh(gates[:, 2 * Hs:3 * Hs])
            o = jax.nn.sigmoid(gates[:, 3 * Hs:4 * Hs])
            cs = f * cs + i * g
            hs = o * jnp.tanh(cs)
            outs.append(hs)
        seq = jnp.stack(outs, axis=1)                             # (B, T, Hs)
    y = act(seq @ params["fc_w"] + params["fc_b"])
    return y @ params["fc2_w"] + params["fc2_b"]


if __name__ == "__main__":
    # Module config: with_tempo=True -> 3 temporal features, is_leaky_relu=True
    input_size = 13
    temporal_features = 3
    fc1_size = 32
    hidden_size = 32
    num_layers = 2
    output_size = 8
    B, T = 2, 8

    key = jax.random.PRNGKey(0)
    kx, kp = jax.random.split(key)
    x = jax.random.normal(kx, (B, T, input_size + temporal_features),
                          dtype=jnp.float32)
    params = init_params(kp, input_size, temporal_features, fc1_size,
                         hidden_size, num_layers, output_size)

    fwd = jax.jit(functools.partial(simple_rnn_forward, is_leaky_relu=True))
    out = jax.block_until_ready(fwd(params, x))
    assert out.shape == (B, T, output_size), out.shape

    with jax.default_matmul_precision("highest"):
        ref = simple_rnn_reference(params, x, is_leaky_relu=True)
    max_err = float(jnp.max(jnp.abs(out - ref)))
    assert jnp.allclose(out, ref, rtol=1e-3, atol=1e-3), max_err

    print("KERNEL_OK")
</pallas_src>

<mosaic_0001>
module attributes {stable_mosaic.version = 11 : i64} {
  func.func @_simple_rnn_kernel(%arg0: memref<16x16xf32, #tpu.memory_space<vmem>>, %arg1: memref<16x32xf32, #tpu.memory_space<vmem>>, %arg2: memref<1x32xf32, #tpu.memory_space<vmem>>, %arg3: memref<32x128xf32, #tpu.memory_space<vmem>>, %arg4: memref<32x128xf32, #tpu.memory_space<vmem>>, %arg5: memref<1x128xf32, #tpu.memory_space<vmem>>, %arg6: memref<32x128xf32, #tpu.memory_space<vmem>>, %arg7: memref<32x128xf32, #tpu.memory_space<vmem>>, %arg8: memref<1x128xf32, #tpu.memory_space<vmem>>, %arg9: memref<32x80xf32, #tpu.memory_space<vmem>>, %arg10: memref<1x80xf32, #tpu.memory_space<vmem>>, %arg11: memref<80x8xf32, #tpu.memory_space<vmem>>, %arg12: memref<1x8xf32, #tpu.memory_space<vmem>>, %arg13: memref<16x8xf32, #tpu.memory_space<vmem>>, %arg14: memref<16x32xf32, #tpu.memory_space<vmem>>) attributes {dimension_semantics = [], scalar_prefetch = 0 : i64, scratch_operands = 1 : i64, tpu.core_type = #tpu.core_type<tc>} {
    %c0 = arith.constant 0 : index
    %c0_0 = arith.constant 0 : index
    %0 = vector.load %arg0[%c0, %c0_0] : memref<16x16xf32, #tpu.memory_space<vmem>>, vector<16x16xf32>
    %c0_1 = arith.constant 0 : index
    %c0_2 = arith.constant 0 : index
    %1 = vector.load %arg1[%c0_1, %c0_2] : memref<16x32xf32, #tpu.memory_space<vmem>>, vector<16x32xf32>
    %cst = arith.constant dense<0.000000e+00> : vector<16x32xf32>
    %2 = tpu.matmul %0, %1, %cst {dimension_numbers = #tpu.dot_dimension_numbers<[1], [0], [0], [1], [0, 0, 1, 1], [], []>} : vector<16x16xf32>, vector<16x32xf32>, vector<16x32xf32> -> vector<16x32xf32>
    %c0_3 = arith.constant 0 : index
    %c0_4 = arith.constant 0 : index
    %3 = vector.load %arg2[%c0_3, %c0_4] : memref<1x32xf32, #tpu.memory_space<vmem>>, vector<1x32xf32>
    %4 = vector.broadcast %3 : vector<1x32xf32> to vector<16x32xf32>
    %5 = arith.addf %2, %4 : vector<16x32xf32>
    %cst_5 = arith.constant 0.000000e+00 : f32
    %6 = vector.broadcast %cst_5 : f32 to vector<16x32xf32>
    %7 = arith.cmpf ogt, %5, %6 : vector<16x32xf32>
    %cst_6 = arith.constant 0.00999999977 : f32
    %8 = vector.broadcast %cst_6 : f32 to vector<16x32xf32>
    %9 = arith.mulf %8, %5 : vector<16x32xf32>
    %10 = arith.select %7, %5, %9 : vector<16x32xi1>, vector<16x32xf32>
    %c0_7 = arith.constant 0 : index
    %c0_8 = arith.constant 0 : index
    %11 = vector.load %arg3[%c0_7, %c0_8] : memref<32x128xf32, #tpu.memory_space<vmem>>, vector<32x128xf32>
    %cst_9 = arith.constant dense<0.000000e+00> : vector<16x128xf32>
    %12 = tpu.matmul %10, %11, %cst_9 {dimension_numbers = #tpu.dot_dimension_numbers<[1], [0], [0], [1], [0, 0, 1, 1], [], []>} : vector<16x32xf32>, vector<32x128xf32>, vector<16x128xf32> -> vector<16x128xf32>
    %c0_10 = arith.constant 0 : index
    %c0_11 = arith.constant 0 : index
    %13 = vector.load %arg5[%c0_10, %c0_11] : memref<1x128xf32, #tpu.memory_space<vmem>>, vector<1x128xf32>
    %14 = vector.broadcast %13 : vector<1x128xf32> to vector<16x128xf32>
    %15 = arith.addf %12, %14 : vector<16x128xf32>
    %c0_12 = arith.constant 0 : index
    %c0_13 = arith.constant 0 : index
    %16 = vector.load %arg4[%c0_12, %c0_13] : memref<32x128xf32, #tpu.memory_space<vmem>>, vector<32x128xf32>
    %cst_14 = arith.constant 0.000000e+00 : f32
    %17 = vector.broadcast %cst_14 : f32 to vector<2x32xf32>
    %cst_15 = arith.constant 0.000000e+00 : f32
    %18 = vector.broadcast %cst_15 : f32 to vector<2x32xf32>
    %19 = vector.extract_strided_slice %15 {offsets = [0, 0], sizes = [2, 128], strides = [1, 1]} : vector<16x128xf32> to vector<2x128xf32>
    %cst_16 = arith.constant dense<0.000000e+00> : vector<2x128xf32>
    %20 = tpu.matmul %17, %16, %cst_16 {dimension_numbers = #tpu.dot_dimension_numbers<[1], [0], [0], [1], [0, 0, 1, 1], [], []>} : vector<2x32xf32>, vector<32x128xf32>, vector<2x128xf32> -> vector<2x128xf32>
    %21 = arith.addf %19, %20 : vector<2x128xf32>
    %22 = vector.extract_strided_slice %21 {offsets = [0, 0], sizes = [2, 96], strides = [1, 1]} : vector<2x128xf32> to vector<2x96xf32>
    %cst_17 = arith.constant 0.000000e+00 : f32
    %23 = vector.broadcast %cst_17 : f32 to vector<2x96xf32>
    %24 = arith.subf %23, %22 : vector<2x96xf32>
    %25 = math.exp %24 : vector<2x96xf32>
    %cst_18 = arith.constant 1.000000e+00 : f32
    %26 = vector.broadcast %cst_18 : f32 to vector<2x96xf32>
    %27 = arith.addf %26, %25 : vector<2x96xf32>
    %cst_19 = arith.constant 1.000000e+00 : f32
    %28 = vector.broadcast %cst_19 : f32 to vector<2x96xf32>
    %29 = arith.divf %28, %27 : vector<2x96xf32>
    %30 = vector.extract_strided_slice %29 {offsets = [0, 0], sizes = [2, 32], strides = [1, 1]} : vector<2x96xf32> to vector<2x32xf32>
    %31 = vector.extract_strided_slice %29 {offsets = [0, 32], sizes = [2, 32], strides = [1, 1]} : vector<2x96xf32> to vector<2x32xf32>
    %32 = vector.extract_strided_slice %29 {offsets = [0, 64], sizes = [2, 32], strides = [1, 1]} : vector<2x96xf32> to vector<2x32xf32>
    %33 = vector.extract_strided_slice %21 {offsets = [0, 96], sizes = [2, 32], strides = [1, 1]} : vector<2x128xf32> to vector<2x32xf32>
    %34 = math.tanh %33 : vector<2x32xf32>
    %35 = arith.mulf %31, %18 : vector<2x32xf32>
    %36 = arith.mulf %30, %34 : vector<2x32xf32>
    %37 = arith.addf %35, %36 : vector<2x32xf32>
    %38 = math.tanh %37 : vector<2x32xf32>
    %39 = arith.mulf %32, %38 : vector<2x32xf32>
    %c0_20 = arith.constant 0 : index
    %c0_21 = arith.constant 0 : index
    %40 = vector.load %arg14[%c0_20, %c0_21] : memref<16x32xf32, #tpu.memory_space<vmem>>, vector<2x32xf32>
    tpu.vector_store %arg14[%c0_20, %c0_21], %39 {strides = array<i32>} : memref<16x32xf32, #tpu.memory_space<vmem>>, vector<2x32xf32>,
    %41 = vector.extract_strided_slice %15 {offsets = [2, 0], sizes = [2, 128], strides = [1, 1]} : vector<16x128xf32> to vector<2x128xf32>
    %cst_22 = arith.constant dense<0.000000e+00> : vector<2x128xf32>
    %42 = tpu.matmul %39, %16, %cst_22 {dimension_numbers = #tpu.dot_dimension_numbers<[1], [0], [0], [1], [0, 0, 1, 1], [], []>} : vector<2x32xf32>, vector<32x128xf32>, vector<2x128xf32> -> vector<2x128xf32>
    %43 = arith.addf %41, %42 : vector<2x128xf32>
    %44 = vector.extract_strided_slice %43 {offsets = [0, 0], sizes = [2, 96], strides = [1, 1]} : vector<2x128xf32> to vector<2x96xf32>
    %cst_23 = arith.constant 0.000000e+00 : f32
    %45 = vector.broadcast %cst_23 : f32 to vector<2x96xf32>
    %46 = arith.subf %45, %44 : vector<2x96xf32>
    %47 = math.exp %46 : vector<2x96xf32>
    %cst_24 = arith.constant 1.000000e+00 : f32
    %48 = vector.broadcast %cst_24 : f32 to vector<2x96xf32>
    %49 = arith.addf %48, %47 : vector<2x96xf32>
    %cst_25 = arith.constant 1.000000e+00 : f32
    %50 = vector.broadcast %cst_25 : f32 to vector<2x96xf32>
    %51 = arith.divf %50, %49 : vector<2x96xf32>
    %52 = vector.extract_strided_slice %51 {offsets = [0, 0], sizes = [2, 32], strides = [1, 1]} : vector<2x96xf32> to vector<2x32xf32>
    %53 = vector.extract_strided_slice %51 {offsets = [0, 32], sizes = [2, 32], strides = [1, 1]} : vector<2x96xf32> to vector<2x32xf32>
    %54 = vector.extract_strided_slice %51 {offsets = [0, 64], sizes = [2, 32], strides = [1, 1]} : vector<2x96xf32> to vector<2x32xf32>
    %55 = vector.extract_strided_slice %43 {offsets = [0, 96], sizes = [2, 32], strides = [1, 1]} : vector<2x128xf32> to vector<2x32xf32>
    %56 = math.tanh %55 : vector<2x32xf32>
    %57 = arith.mulf %53, %37 : vector<2x32xf32>
    %58 = arith.mulf %52, %56 : vector<2x32xf32>
    %59 = arith.addf %57, %58 : vector<2x32xf32>
    %60 = math.tanh %59 : vector<2x32xf32>
    %61 = arith.mulf %54, %60 : vector<2x32xf32>
    %c2 = arith.constant 2 : index
    %c0_26 = arith.constant 0 : index
    %62 = vector.load %arg14[%c2, %c0_26] : memref<16x32xf32, #tpu.memory_space<vmem>>, vector<2x32xf32>
    tpu.vector_store %arg14[%c2, %c0_26], %61 {strides = array<i32>} : memref<16x32xf32, #tpu.memory_space<vmem>>, vector<2x32xf32>,
    %63 = vector.extract_strided_slice %15 {offsets = [4, 0], sizes = [2, 128], strides = [1, 1]} : vector<16x128xf32> to vector<2x128xf32>
    %cst_27 = arith.constant dense<0.000000e+00> : vector<2x128xf32>
    %64 = tpu.matmul %61, %16, %cst_27 {dimension_numbers = #tpu.dot_dimension_numbers<[1], [0], [0], [1], [0, 0, 1, 1], [], []>} : vector<2x32xf32>, vector<32x128xf32>, vector<2x128xf32> -> vector<2x128xf32>
    %65 = arith.addf %63, %64 : vector<2x128xf32>
    %66 = vector.extract_strided_slice %65 {offsets = [0, 0], sizes = [2, 96], strides = [1, 1]} : vector<2x128xf32> to vector<2x96xf32>
    %cst_28 = arith.constant 0.000000e+00 : f32
    %67 = vector.broadcast %cst_28 : f32 to vector<2x96xf32>
    %68 = arith.subf %67, %66 : vector<2x96xf32>
    %69 = math.exp %68 : vector<2x96xf32>
    %cst_29 = arith.constant 1.000000e+00 : f32
    %70 = vector.broadcast %cst_29 : f32 to vector<2x96xf32>
    %71 = arith.addf %70, %69 : vector<2x96xf32>
    %cst_30 = arith.constant 1.000000e+00 : f32
    %72 = vector.broadcast %cst_30 : f32 to vector<2x96xf32>
    %73 = arith.divf %72, %71 : vector<2x96xf32>
    %74 = vector.extract_strided_slice %73 {offsets = [0, 0], sizes = [2, 32], strides = [1, 1]} : vector<2x96xf32> to vector<2x32xf32>
    %75 = vector.extract_strided_slice %73 {offsets = [0, 32], sizes = [2, 32], strides = [1, 1]} : vector<2x96xf32> to vector<2x32xf32>
    %76 = vector.extract_strided_slice %73 {offsets = [0, 64], sizes = [2, 32], strides = [1, 1]} : vector<2x96xf32> to vector<2x32xf32>
    %77 = vector.extract_strided_slice %65 {offsets = [0, 96], sizes = [2, 32], strides = [1, 1]} : vector<2x128xf32> to vector<2x32xf32>
    %78 = math.tanh %77 : vector<2x32xf32>
    %79 = arith.mulf %75, %59 : vector<2x32xf32>
    %80 = arith.mulf %74, %78 : vector<2x32xf32>
    %81 = arith.addf %79, %80 : vector<2x32xf32>
    %82 = math.tanh %81 : vector<2x32xf32>
    %83 = arith.mulf %76, %82 : vector<2x32xf32>
    %c4 = arith.constant 4 : index
    %c0_31 = arith.constant 0 : index
    %84 = vector.load %arg14[%c4, %c0_31] : memref<16x32xf32, #tpu.memory_space<vmem>>, vector<2x32xf32>
    tpu.vector_store %arg14[%c4, %c0_31], %83 {strides = array<i32>} : memref<16x32xf32, #tpu.memory_space<vmem>>, vector<2x32xf32>,
    %85 = vector.extract_strided_slice %15 {offsets = [6, 0], sizes = [2, 128], strides = [1, 1]} : vector<16x128xf32> to vector<2x128xf32>
    %cst_32 = arith.constant dense<0.000000e+00> : vector<2x128xf32>
    %86 = tpu.matmul %83, %16, %cst_32 {dimension_numbers = #tpu.dot_dimension_numbers<[1], [0], [0], [1], [0, 0, 1, 1], [], []>} : vector<2x32xf32>, vector<32x128xf32>, vector<2x128xf32> -> vector<2x128xf32>
    %87 = arith.addf %85, %86 : vector<2x128xf32>
    %88 = vector.extract_strided_slice %87 {offsets = [0, 0], sizes = [2, 96], strides = [1, 1]} : vector<2x128xf32> to vector<2x96xf32>
    %cst_33 = arith.constant 0.000000e+00 : f32
    %89 = vector.broadcast %cst_33 : f32 to vector<2x96xf32>
    %90 = arith.subf %89, %88 : vector<2x96xf32>
    %91 = math.exp %90 : vector<2x96xf32>
    %cst_34 = arith.constant 1.000000e+00 : f32
    %92 = vector.broadcast %cst_34 : f32 to vector<2x96xf32>
    %93 = arith.addf %92, %91 : vector<2x96xf32>
    %cst_35 = arith.constant 1.000000e+00 : f32
    %94 = vector.broadcast %cst_35 : f32 to vector<2x96xf32>
    %95 = arith.divf %94, %93 : vector<2x96xf32>
    %96 = vector.extract_strided_slice %95 {offsets = [0, 0], sizes = [2, 32], strides = [1, 1]} : vector<2x96xf32> to vector<2x32xf32>
    %97 = vector.extract_strided_slice %95 {offsets = [0, 32], sizes = [2, 32], strides = [1, 1]} : vector<2x96xf32> to vector<2x32xf32>
    %98 = vector.extract_strided_slice %95 {offsets = [0, 64], sizes = [2, 32], strides = [1, 1]} : vector<2x96xf32> to vector<2x32xf32>
    %99 = vector.extract_strided_slice %87 {offsets = [0, 96], sizes = [2, 32], strides = [1, 1]} : vector<2x128xf32> to vector<2x32xf32>
    %100 = math.tanh %99 : vector<2x32xf32>
    %101 = arith.mulf %97, %81 : vector<2x32xf32>
    %102 = arith.mulf %96, %100 : vector<2x32xf32>
    %103 = arith.addf %101, %102 : vector<2x32xf32>
    %104 = math.tanh %103 : vector<2x32xf32>
    %105 = arith.mulf %98, %104 : vector<2x32xf32>
    %c6 = arith.constant 6 : index
    %c0_36 = arith.constant 0 : index
    %106 = vector.load %arg14[%c6, %c0_36] : memref<16x32xf32, #tpu.memory_space<vmem>>, vector<2x32xf32>
    tpu.vector_store %arg14[%c6, %c0_36], %105 {strides = array<i32>} : memref<16x32xf32, #tpu.memory_space<vmem>>, vector<2x32xf32>,
    %107 = vector.extract_strided_slice %15 {offsets = [8, 0], sizes = [2, 128], strides = [1, 1]} : vector<16x128xf32> to vector<2x128xf32>
    %cst_37 = arith.constant dense<0.000000e+00> : vector<2x128xf32>
    %108 = tpu.matmul %105, %16, %cst_37 {dimension_numbers = #tpu.dot_dimension_numbers<[1], [0], [0], [1], [0, 0, 1, 1], [], []>} : vector<2x32xf32>, vector<32x128xf32>, vector<2x128xf32> -> vector<2x128xf32>
    %109 = arith.addf %107, %108 : vector<2x128xf32>
    %110 = vector.extract_strided_slice %109 {offsets = [0, 0], sizes = [2, 96], strides = [1, 1]} : vector<2x128xf32> to vector<2x96xf32>
    %cst_38 = arith.constant 0.000000e+00 : f32
    %111 = vector.broadcast %cst_38 : f32 to vector<2x96xf32>
    %112 = arith.subf %111, %110 : vector<2x96xf32>
    %113 = math.exp %112 : vector<2x96xf32>
    %cst_39 = arith.constant 1.000000e+00 : f32
    %114 = vector.broadcast %cst_39 : f32 to vector<2x96xf32>
    %115 = arith.addf %114, %113 : vector<2x96xf32>
    %cst_40 = arith.constant 1.000000e+00 : f32
    %116 = vector.broadcast %cst_40 : f32 to vector<2x96xf32>
    %117 = arith.divf %116, %115 : vector<2x96xf32>
    %118 = vector.extract_strided_slice %117 {offsets = [0, 0], sizes = [2, 32], strides = [1, 1]} : vector<2x96xf32> to vector<2x32xf32>
    %119 = vector.extract_strided_slice %117 {offsets = [0, 32], sizes = [2, 32], strides = [1, 1]} : vector<2x96xf32> to vector<2x32xf32>
    %120 = vector.extract_strided_slice %117 {offsets = [0, 64], sizes = [2, 32], strides = [1, 1]} : vector<2x96xf32> to vector<2x32xf32>
    %121 = vector.extract_strided_slice %109 {offsets = [0, 96], sizes = [2, 32], strides = [1, 1]} : vector<2x128xf32> to vector<2x32xf32>
    %122 = math.tanh %121 : vector<2x32xf32>
    %123 = arith.mulf %119, %103 : vector<2x32xf32>
    %124 = arith.mulf %118, %122 : vector<2x32xf32>
    %125 = arith.addf %123, %124 : vector<2x32xf32>
    %126 = math.tanh %125 : vector<2x32xf32>
    %127 = arith.mulf %120, %126 : vector<2x32xf32>
    %c8 = arith.constant 8 : index
    %c0_41 = arith.constant 0 : index
    %128 = vector.load %arg14[%c8, %c0_41] : memref<16x32xf32, #tpu.memory_space<vmem>>, vector<2x32xf32>
    tpu.vector_store %arg14[%c8, %c0_41], %127 {strides = array<i32>} : memref<16x32xf32, #tpu.memory_space<vmem>>, vector<2x32xf32>,
    %129 = vector.extract_strided_slice %15 {offsets = [10, 0], sizes = [2, 128], strides = [1, 1]} : vector<16x128xf32> to vector<2x128xf32>
    %cst_42 = arith.constant dense<0.000000e+00> : vector<2x128xf32>
    %130 = tpu.matmul %127, %16, %cst_42 {dimension_numbers = #tpu.dot_dimension_numbers<[1], [0], [0], [1], [0, 0, 1, 1], [], []>} : vector<2x32xf32>, vector<32x128xf32>, vector<2x128xf32> -> vector<2x128xf32>
    %131 = arith.addf %129, %130 : vector<2x128xf32>
    %132 = vector.extract_strided_slice %131 {offsets = [0, 0], sizes = [2, 96], strides = [1, 1]} : vector<2x128xf32> to vector<2x96xf32>
    %cst_43 = arith.constant 0.000000e+00 : f32
    %133 = vector.broadcast %cst_43 : f32 to vector<2x96xf32>
    %134 = arith.subf %133, %132 : vector<2x96xf32>
    %135 = math.exp %134 : vector<2x96xf32>
    %cst_44 = arith.constant 1.000000e+00 : f32
    %136 = vector.broadcast %cst_44 : f32 to vector<2x96xf32>
    %137 = arith.addf %136, %135 : vector<2x96xf32>
    %cst_45 = arith.constant 1.000000e+00 : f32
    %138 = vector.broadcast %cst_45 : f32 to vector<2x96xf32>
    %139 = arith.divf %138, %137 : vector<2x96xf32>
    %140 = vector.extract_strided_slice %139 {offsets = [0, 0], sizes = [2, 32], strides = [1, 1]} : vector<2x96xf32> to vector<2x32xf32>
    %141 = vector.extract_strided_slice %139 {offsets = [0, 32], sizes = [2, 32], strides = [1, 1]} : vector<2x96xf32> to vector<2x32xf32>
    %142 = vector.extract_strided_slice %139 {offsets = [0, 64], sizes = [2, 32], strides = [1, 1]} : vector<2x96xf32> to vector<2x32xf32>
    %143 = vector.extract_strided_slice %131 {offsets = [0, 96], sizes = [2, 32], strides = [1, 1]} : vector<2x128xf32> to vector<2x32xf32>
    %144 = math.tanh %143 : vector<2x32xf32>
    %145 = arith.mulf %141, %125 : vector<2x32xf32>
    %146 = arith.mulf %140, %144 : vector<2x32xf32>
    %147 = arith.addf %145, %146 : vector<2x32xf32>
    %148 = math.tanh %147 : vector<2x32xf32>
    %149 = arith.mulf %142, %148 : vector<2x32xf32>
    %c10 = arith.constant 10 : index
    %c0_46 = arith.constant 0 : index
    %150 = vector.load %arg14[%c10, %c0_46] : memref<16x32xf32, #tpu.memory_space<vmem>>, vector<2x32xf32>
    tpu.vector_store %arg14[%c10, %c0_46], %149 {strides = array<i32>} : memref<16x32xf32, #tpu.memory_space<vmem>>, vector<2x32xf32>,
    %151 = vector.extract_strided_slice %15 {offsets = [12, 0], sizes = [2, 128], strides = [1, 1]} : vector<16x128xf32> to vector<2x128xf32>
    %cst_47 = arith.constant dense<0.000000e+00> : vector<2x128xf32>
    %152 = tpu.matmul %149, %16, %cst_47 {dimension_numbers = #tpu.dot_dimension_numbers<[1], [0], [0], [1], [0, 0, 1, 1], [], []>} : vector<2x32xf32>, vector<32x128xf32>, vector<2x128xf32> -> vector<2x128xf32>
    %153 = arith.addf %151, %152 : vector<2x128xf32>
    %154 = vector.extract_strided_slice %153 {offsets = [0, 0], sizes = [2, 96], strides = [1, 1]} : vector<2x128xf32> to vector<2x96xf32>
    %cst_48 = arith.constant 0.000000e+00 : f32
    %155 = vector.broadcast %cst_48 : f32 to vector<2x96xf32>
    %156 = arith.subf %155, %154 : vector<2x96xf32>
    %157 = math.exp %156 : vector<2x96xf32>
    %cst_49 = arith.constant 1.000000e+00 : f32
    %158 = vector.broadcast %cst_49 : f32 to vector<2x96xf32>
    %159 = arith.addf %158, %157 : vector<2x96xf32>
    %cst_50 = arith.constant 1.000000e+00 : f32
    %160 = vector.broadcast %cst_50 : f32 to vector<2x96xf32>
    %161 = arith.divf %160, %159 : vector<2x96xf32>
    %162 = vector.extract_strided_slice %161 {offsets = [0, 0], sizes = [2, 32], strides = [1, 1]} : vector<2x96xf32> to vector<2x32xf32>
    %163 = vector.extract_strided_slice %161 {offsets = [0, 32], sizes = [2, 32], strides = [1, 1]} : vector<2x96xf32> to vector<2x32xf32>
    %164 = vector.extract_strided_slice %161 {offsets = [0, 64], sizes = [2, 32], strides = [1, 1]} : vector<2x96xf32> to vector<2x32xf32>
    %165 = vector.extract_strided_slice %153 {offsets = [0, 96], sizes = [2, 32], strides = [1, 1]} : vector<2x128xf32> to vector<2x32xf32>
    %166 = math.tanh %165 : vector<2x32xf32>
    %167 = arith.mulf %163, %147 : vector<2x32xf32>
    %168 = arith.mulf %162, %166 : vector<2x32xf32>
    %169 = arith.addf %167, %168 : vector<2x32xf32>
    %170 = math.tanh %169 : vector<2x32xf32>
    %171 = arith.mulf %164, %170 : vector<2x32xf32>
    %c12 = arith.constant 12 : index
    %c0_51 = arith.constant 0 : index
    %172 = vector.load %arg14[%c12, %c0_51] : memref<16x32xf32, #tpu.memory_space<vmem>>, vector<2x32xf32>
    tpu.vector_store %arg14[%c12, %c0_51], %171 {strides = array<i32>} : memref<16x32xf32, #tpu.memory_space<vmem>>, vector<2x32xf32>,
    %173 = vector.extract_strided_slice %15 {offsets = [14, 0], sizes = [2, 128], strides = [1, 1]} : vector<16x128xf32> to vector<2x128xf32>
    %cst_52 = arith.constant dense<0.000000e+00> : vector<2x128xf32>
    %174 = tpu.matmul %171, %16, %cst_52 {dimension_numbers = #tpu.dot_dimension_numbers<[1], [0], [0], [1], [0, 0, 1, 1], [], []>} : vector<2x32xf32>, vector<32x128xf32>, vector<2x128xf32> -> vector<2x128xf32>
    %175 = arith.addf %173, %174 : vector<2x128xf32>
    %176 = vector.extract_strided_slice %175 {offsets = [0, 0], sizes = [2, 96], strides = [1, 1]} : vector<2x128xf32> to vector<2x96xf32>
    %cst_53 = arith.constant 0.000000e+00 : f32
    %177 = vector.broadcast %cst_53 : f32 to vector<2x96xf32>
    %178 = arith.subf %177, %176 : vector<2x96xf32>
    %179 = math.exp %178 : vector<2x96xf32>
    %cst_54 = arith.constant 1.000000e+00 : f32
    %180 = vector.broadcast %cst_54 : f32 to vector<2x96xf32>
    %181 = arith.addf %180, %179 : vector<2x96xf32>
    %cst_55 = arith.constant 1.000000e+00 : f32
    %182 = vector.broadcast %cst_55 : f32 to vector<2x96xf32>
    %183 = arith.divf %182, %181 : vector<2x96xf32>
    %184 = vector.extract_strided_slice %183 {offsets = [0, 0], sizes = [2, 32], strides = [1, 1]} : vector<2x96xf32> to vector<2x32xf32>
    %185 = vector.extract_strided_slice %183 {offsets = [0, 32], sizes = [2, 32], strides = [1, 1]} : vector<2x96xf32> to vector<2x32xf32>
    %186 = vector.extract_strided_slice %183 {offsets = [0, 64], sizes = [2, 32], strides = [1, 1]} : vector<2x96xf32> to vector<2x32xf32>
    %187 = vector.extract_strided_slice %175 {offsets = [0, 96], sizes = [2, 32], strides = [1, 1]} : vector<2x128xf32> to vector<2x32xf32>
    %188 = math.tanh %187 : vector<2x32xf32>
    %189 = arith.mulf %185, %169 : vector<2x32xf32>
    %190 = arith.mulf %184, %188 : vector<2x32xf32>
    %191 = arith.addf %189, %190 : vector<2x32xf32>
    %192 = math.tanh %191 : vector<2x32xf32>
    %193 = arith.mulf %186, %192 : vector<2x32xf32>
    %c14 = arith.constant 14 : index
    %c0_56 = arith.constant 0 : index
    %194 = vector.load %arg14[%c14, %c0_56] : memref<16x32xf32, #tpu.memory_space<vmem>>, vector<2x32xf32>
    tpu.vector_store %arg14[%c14, %c0_56], %193 {strides = array<i32>} : memref<16x32xf32, #tpu.memory_space<vmem>>, vector<2x32xf32>,
    %c0_57 = arith.constant 0 : index
    %c0_58 = arith.constant 0 : index
    %195 = vector.load %arg14[%c0_57, %c0_58] : memref<16x32xf32, #tpu.memory_space<vmem>>, vector<16x32xf32>
    %c0_59 = arith.constant 0 : index
    %c0_60 = arith.constant 0 : index
    %196 = vector.load %arg6[%c0_59, %c0_60] : memref<32x128xf32, #tpu.memory_space<vmem>>, vector<32x128xf32>
    %cst_61 = arith.constant dense<0.000000e+00> : vector<16x128xf32>
    %197 = tpu.matmul %195, %196, %cst_61 {dimension_numbers = #tpu.dot_dimension_numbers<[1], [0], [0], [1], [0, 0, 1, 1], [], []>} : vector<16x32xf32>, vector<32x128xf32>, vector<16x128xf32> -> vector<16x128xf32>
    %c0_62 = arith.constant 0 : index
    %c0_63 = arith.constant 0 : index
    %198 = vector.load %arg8[%c0_62, %c0_63] : memref<1x128xf32, #tpu.memory_space<vmem>>, vector<1x128xf32>
    %199 = vector.broadcast %198 : vector<1x128xf32> to vector<16x128xf32>
    %200 = arith.addf %197, %199 : vector<16x128xf32>
    %c0_64 = arith.constant 0 : index
    %c0_65 = arith.constant 0 : index
    %201 = vector.load %arg7[%c0_64, %c0_65] : memref<32x128xf32, #tpu.memory_space<vmem>>, vector<32x128xf32>
    %cst_66 = arith.constant 0.000000e+00 : f32
    %202 = vector.broadcast %cst_66 : f32 to vector<2x32xf32>
    %cst_67 = arith.constant 0.000000e+00 : f32
    %203 = vector.broadcast %cst_67 : f32 to vector<2x32xf32>
    %204 = vector.extract_strided_slice %200 {offsets = [0, 0], sizes = [2, 128], strides = [1, 1]} : vector<16x128xf32> to vector<2x128xf32>
    %cst_68 = arith.constant dense<0.000000e+00> : vector<2x128xf32>
    %205 = tpu.matmul %202, %201, %cst_68 {dimension_numbers = #tpu.dot_dimension_numbers<[1], [0], [0], [1], [0, 0, 1, 1], [], []>} : vector<2x32xf32>, vector<32x128xf32>, vector<2x128xf32> -> vector<2x128xf32>
    %206 = arith.addf %204, %205 : vector<2x128xf32>
    %207 = vector.extract_strided_slice %206 {offsets = [0, 0], sizes = [2, 96], strides = [1, 1]} : vector<2x128xf32> to vector<2x96xf32>
    %cst_69 = arith.constant 0.000000e+00 : f32
    %208 = vector.broadcast %cst_69 : f32 to vector<2x96xf32>
    %209 = arith.subf %208, %207 : vector<2x96xf32>
    %210 = math.exp %209 : vector<2x96xf32>
    %cst_70 = arith.constant 1.000000e+00 : f32
    %211 = vector.broadcast %cst_70 : f32 to vector<2x96xf32>
    %212 = arith.addf %211, %210 : vector<2x96xf32>
    %cst_71 = arith.constant 1.000000e+00 : f32
    %213 = vector.broadcast %cst_71 : f32 to vector<2x96xf32>
    %214 = arith.divf %213, %212 : vector<2x96xf32>
    %215 = vector.extract_strided_slice %214 {offsets = [0, 0], sizes = [2, 32], strides = [1, 1]} : vector<2x96xf32> to vector<2x32xf32>
    %216 = vector.extract_strided_slice %214 {offsets = [0, 32], sizes = [2, 32], strides = [1, 1]} : vector<2x96xf32> to vector<2x32xf32>
    %217 = vector.extract_strided_slice %214 {offsets = [0, 64], sizes = [2, 32], strides = [1, 1]} : vector<2x96xf32> to vector<2x32xf32>
    %218 = vector.extract_strided_slice %206 {offsets = [0, 96], sizes = [2, 32], strides = [1, 1]} : vector<2x128xf32> to vector<2x32xf32>
    %219 = math.tanh %218 : vector<2x32xf32>
    %220 = arith.mulf %216, %203 : vector<2x32xf32>
    %221 = arith.mulf %215, %219 : vector<2x32xf32>
    %222 = arith.addf %220, %221 : vector<2x32xf32>
    %223 = math.tanh %222 : vector<2x32xf32>
    %224 = arith.mulf %217, %223 : vector<2x32xf32>
    %c0_72 = arith.constant 0 : index
    %c0_73 = arith.constant 0 : index
    %225 = vector.load %arg14[%c0_72, %c0_73] : memref<16x32xf32, #tpu.memory_space<vmem>>, vector<2x32xf32>
    tpu.vector_store %arg14[%c0_72, %c0_73], %224 {strides = array<i32>} : memref<16x32xf32, #tpu.memory_space<vmem>>, vector<2x32xf32>,
    %226 = vector.extract_strided_slice %200 {offsets = [2, 0], sizes = [2, 128], strides = [1, 1]} : vector<16x128xf32> to vector<2x128xf32>
    %cst_74 = arith.constant dense<0.000000e+00> : vector<2x128xf32>
    %227 = tpu.matmul %224, %201, %cst_74 {dimension_numbers = #tpu.dot_dimension_numbers<[1], [0], [0], [1], [0, 0, 1, 1], [], []>} : vector<2x32xf32>, vector<32x128xf32>, vector<2x128xf32> -> vector<2x128xf32>
    %228 = arith.addf %226, %227 : vector<2x128xf32>
    %229 = vector.extract_strided_slice %228 {offsets = [0, 0], sizes = [2, 96], strides = [1, 1]} : vector<2x128xf32> to vector<2x96xf32>
    %cst_75 = arith.constant 0.000000e+00 : f32
    %230 = vector.broadcast %cst_75 : f32 to vector<2x96xf32>
    %231 = arith.subf %230, %229 : vector<2x96xf32>
    %232 = math.exp %231 : vector<2x96xf32>
    %cst_76 = arith.constant 1.000000e+00 : f32
    %233 = vector.broadcast %cst_76 : f32 to vector<2x96xf32>
    %234 = arith.addf %233, %232 : vector<2x96xf32>
    %cst_77 = arith.constant 1.000000e+00 : f32
    %235 = vector.broadcast %cst_77 : f32 to vector<2x96xf32>
    %236 = arith.divf %235, %234 : vector<2x96xf32>
    %237 = vector.extract_strided_slice %236 {offsets = [0, 0], sizes = [2, 32], strides = [1, 1]} : vector<2x96xf32> to vector<2x32xf32>
    %238 = vector.extract_strided_slice %236 {offsets = [0, 32], sizes = [2, 32], strides = [1, 1]} : vector<2x96xf32> to vector<2x32xf32>
    %239 = vector.extract_strided_slice %236 {offsets = [0, 64], sizes = [2, 32], strides = [1, 1]} : vector<2x96xf32> to vector<2x32xf32>
    %240 = vector.extract_strided_slice %228 {offsets = [0, 96], sizes = [2, 32], strides = [1, 1]} : vector<2x128xf32> to vector<2x32xf32>
    %241 = math.tanh %240 : vector<2x32xf32>
    %242 = arith.mulf %238, %222 : vector<2x32xf32>
    %243 = arith.mulf %237, %241 : vector<2x32xf32>
    %244 = arith.addf %242, %243 : vector<2x32xf32>
    %245 = math.tanh %244 : vector<2x32xf32>
    %246 = arith.mulf %239, %245 : vector<2x32xf32>
    %c2_78 = arith.constant 2 : index
    %c0_79 = arith.constant 0 : index
    %247 = vector.load %arg14[%c2_78, %c0_79] : memref<16x32xf32, #tpu.memory_space<vmem>>, vector<2x32xf32>
    tpu.vector_store %arg14[%c2_78, %c0_79], %246 {strides = array<i32>} : memref<16x32xf32, #tpu.memory_space<vmem>>, vector<2x32xf32>,
    %248 = vector.extract_strided_slice %200 {offsets = [4, 0], sizes = [2, 128], strides = [1, 1]} : vector<16x128xf32> to vector<2x128xf32>
    %cst_80 = arith.constant dense<0.000000e+00> : vector<2x128xf32>
    %249 = tpu.matmul %246, %201, %cst_80 {dimension_numbers = #tpu.dot_dimension_numbers<[1], [0], [0], [1], [0, 0, 1, 1], [], []>} : vector<2x32xf32>, vector<32x128xf32>, vector<2x128xf32> -> vector<2x128xf32>
    %250 = arith.addf %248, %249 : vector<2x128xf32>
    %251 = vector.extract_strided_slice %250 {offsets = [0, 0], sizes = [2, 96], strides = [1, 1]} : vector<2x128xf32> to vector<2x96xf32>
    %cst_81 = arith.constant 0.000000e+00 : f32
    %252 = vector.broadcast %cst_81 : f32 to vector<2x96xf32>
    %253 = arith.subf %252, %251 : vector<2x96xf32>
    %254 = math.exp %253 : vector<2x96xf32>
    %cst_82 = arith.constant 1.000000e+00 : f32
    %255 = vector.broadcast %cst_82 : f32 to vector<2x96xf32>
    %256 = arith.addf %255, %254 : vector<2x96xf32>
    %cst_83 = arith.constant 1.000000e+00 : f32
    %257 = vector.broadcast %cst_83 : f32 to vector<2x96xf32>
    %258 = arith.divf %257, %256 : vector<2x96xf32>
    %259 = vector.extract_strided_slice %258 {offsets = [0, 0], sizes = [2, 32], strides = [1, 1]} : vector<2x96xf32> to vector<2x32xf32>
    %260 = vector.extract_strided_slice %258 {offsets = [0, 32], sizes = [2, 32], strides = [1, 1]} : vector<2x96xf32> to vector<2x32xf32>
    %261 = vector.extract_strided_slice %258 {offsets = [0, 64], sizes = [2, 32], strides = [1, 1]} : vector<2x96xf32> to vector<2x32xf32>
    %262 = vector.extract_strided_slice %250 {offsets = [0, 96], sizes = [2, 32], strides = [1, 1]} : vector<2x128xf32> to vector<2x32xf32>
    %263 = math.tanh %262 : vector<2x32xf32>
    %264 = arith.mulf %260, %244 : vector<2x32xf32>
    %265 = arith.mulf %259, %263 : vector<2x32xf32>
    %266 = arith.addf %264, %265 : vector<2x32xf32>
    %267 = math.tanh %266 : vector<2x32xf32>
    %268 = arith.mulf %261, %267 : vector<2x32xf32>
    %c4_84 = arith.constant 4 : index
    %c0_85 = arith.constant 0 : index
    %269 = vector.load %arg14[%c4_84, %c0_85] : memref<16x32xf32, #tpu.memory_space<vmem>>, vector<2x32xf32>
    tpu.vector_store %arg14[%c4_84, %c0_85], %268 {strides = array<i32>} : memref<16x32xf32, #tpu.memory_space<vmem>>, vector<2x32xf32>,
    %270 = vector.extract_strided_slice %200 {offsets = [6, 0], sizes = [2, 128], strides = [1, 1]} : vector<16x128xf32> to vector<2x128xf32>
    %cst_86 = arith.constant dense<0.000000e+00> : vector<2x128xf32>
    %271 = tpu.matmul %268, %201, %cst_86 {dimension_numbers = #tpu.dot_dimension_numbers<[1], [0], [0], [1], [0, 0, 1, 1], [], []>} : vector<2x32xf32>, vector<32x128xf32>, vector<2x128xf32> -> vector<2x128xf32>
    %272 = arith.addf %270, %271 : vector<2x128xf32>
    %273 = vector.extract_strided_slice %272 {offsets = [0, 0], sizes = [2, 96], strides = [1, 1]} : vector<2x128xf32> to vector<2x96xf32>
    %cst_87 = arith.constant 0.000000e+00 : f32
    %274 = vector.broadcast %cst_87 : f32 to vector<2x96xf32>
    %275 = arith.subf %274, %273 : vector<2x96xf32>
    %276 = math.exp %275 : vector<2x96xf32>
    %cst_88 = arith.constant 1.000000e+00 : f32
    %277 = vector.broadcast %cst_88 : f32 to vector<2x96xf32>
    %278 = arith.addf %277, %276 : vector<2x96xf32>
    %cst_89 = arith.constant 1.000000e+00 : f32
    %279 = vector.broadcast %cst_89 : f32 to vector<2x96xf32>
    %280 = arith.divf %279, %278 : vector<2x96xf32>
    %281 = vector.extract_strided_slice %280 {offsets = [0, 0], sizes = [2, 32], strides = [1, 1]} : vector<2x96xf32> to vector<2x32xf32>
    %282 = vector.extract_strided_slice %280 {offsets = [0, 32], sizes = [2, 32], strides = [1, 1]} : vector<2x96xf32> to vector<2x32xf32>
    %283 = vector.extract_strided_slice %280 {offsets = [0, 64], sizes = [2, 32], strides = [1, 1]} : vector<2x96xf32> to vector<2x32xf32>
    %284 = vector.extract_strided_slice %272 {offsets = [0, 96], sizes = [2, 32], strides = [1, 1]} : vector<2x128xf32> to vector<2x32xf32>
    %285 = math.tanh %284 : vector<2x32xf32>
    %286 = arith.mulf %282, %266 : vector<2x32xf32>
    %287 = arith.mulf %281, %285 : vector<2x32xf32>
    %288 = arith.addf %286, %287 : vector<2x32xf32>
    %289 = math.tanh %288 : vector<2x32xf32>
    %290 = arith.mulf %283, %289 : vector<2x32xf32>
    %c6_90 = arith.constant 6 : index
    %c0_91 = arith.constant 0 : index
    %291 = vector.load %arg14[%c6_90, %c0_91] : memref<16x32xf32, #tpu.memory_space<vmem>>, vector<2x32xf32>
    tpu.vector_store %arg14[%c6_90, %c0_91], %290 {strides = array<i32>} : memref<16x32xf32, #tpu.memory_space<vmem>>, vector<2x32xf32>,
    %292 = vector.extract_strided_slice %200 {offsets = [8, 0], sizes = [2, 128], strides = [1, 1]} : vector<16x128xf32> to vector<2x128xf32>
    %cst_92 = arith.constant dense<0.000000e+00> : vector<2x128xf32>
    %293 = tpu.matmul %290, %201, %cst_92 {dimension_numbers = #tpu.dot_dimension_numbers<[1], [0], [0], [1], [0, 0, 1, 1], [], []>} : vector<2x32xf32>, vector<32x128xf32>, vector<2x128xf32> -> vector<2x128xf32>
    %294 = arith.addf %292, %293 : vector<2x128xf32>
    %295 = vector.extract_strided_slice %294 {offsets = [0, 0], sizes = [2, 96], strides = [1, 1]} : vector<2x128xf32> to vector<2x96xf32>
    %cst_93 = arith.constant 0.000000e+00 : f32
    %296 = vector.broadcast %cst_93 : f32 to vector<2x96xf32>
    %297 = arith.subf %296, %295 : vector<2x96xf32>
    %298 = math.exp %297 : vector<2x96xf32>
    %cst_94 = arith.constant 1.000000e+00 : f32
    %299 = vector.broadcast %cst_94 : f32 to vector<2x96xf32>
    %300 = arith.addf %299, %298 : vector<2x96xf32>
    %cst_95 = arith.constant 1.000000e+00 : f32
    %301 = vector.broadcast %cst_95 : f32 to vector<2x96xf32>
    %302 = arith.divf %301, %300 : vector<2x96xf32>
    %303 = vector.extract_strided_slice %302 {offsets = [0, 0], sizes = [2, 32], strides = [1, 1]} : vector<2x96xf32> to vector<2x32xf32>
    %304 = vector.extract_strided_slice %302 {offsets = [0, 32], sizes = [2, 32], strides = [1, 1]} : vector<2x96xf32> to vector<2x32xf32>
    %305 = vector.extract_strided_slice %302 {offsets = [0, 64], sizes = [2, 32], strides = [1, 1]} : vector<2x96xf32> to vector<2x32xf32>
    %306 = vector.extract_strided_slice %294 {offsets = [0, 96], sizes = [2, 32], strides = [1, 1]} : vector<2x128xf32> to vector<2x32xf32>
    %307 = math.tanh %306 : vector<2x32xf32>
    %308 = arith.mulf %304, %288 : vector<2x32xf32>
    %309 = arith.mulf %303, %307 : vector<2x32xf32>
    %310 = arith.addf %308, %309 : vector<2x32xf32>
    %311 = math.tanh %310 : vector<2x32xf32>
    %312 = arith.mulf %305, %311 : vector<2x32xf32>
    %c8_96 = arith.constant 8 : index
    %c0_97 = arith.constant 0 : index
    %313 = vector.load %arg14[%c8_96, %c0_97] : memref<16x32xf32, #tpu.memory_space<vmem>>, vector<2x32xf32>
    tpu.vector_store %arg14[%c8_96, %c0_97], %312 {strides = array<i32>} : memref<16x32xf32, #tpu.memory_space<vmem>>, vector<2x32xf32>,
    %314 = vector.extract_strided_slice %200 {offsets = [10, 0], sizes = [2, 128], strides = [1, 1]} : vector<16x128xf32> to vector<2x128xf32>
    %cst_98 = arith.constant dense<0.000000e+00> : vector<2x128xf32>
    %315 = tpu.matmul %312, %201, %cst_98 {dimension_numbers = #tpu.dot_dimension_numbers<[1], [0], [0], [1], [0, 0, 1, 1], [], []>} : vector<2x32xf32>, vector<32x128xf32>, vector<2x128xf32> -> vector<2x128xf32>
    %316 = arith.addf %314, %315 : vector<2x128xf32>
    %317 = vector.extract_strided_slice %316 {offsets = [0, 0], sizes = [2, 96], strides = [1, 1]} : vector<2x128xf32> to vector<2x96xf32>
    %cst_99 = arith.constant 0.000000e+00 : f32
    %318 = vector.broadcast %cst_99 : f32 to vector<2x96xf32>
    %319 = arith.subf %318, %317 : vector<2x96xf32>
    %320 = math.exp %319 : vector<2x96xf32>
    %cst_100 = arith.constant 1.000000e+00 : f32
    %321 = vector.broadcast %cst_100 : f32 to vector<2x96xf32>
    %322 = arith.addf %321, %320 : vector<2x96xf32>
    %cst_101 = arith.constant 1.000000e+00 : f32
    %323 = vector.broadcast %cst_101 : f32 to vector<2x96xf32>
    %324 = arith.divf %323, %322 : vector<2x96xf32>
    %325 = vector.extract_strided_slice %324 {offsets = [0, 0], sizes = [2, 32], strides = [1, 1]} : vector<2x96xf32> to vector<2x32xf32>
    %326 = vector.extract_strided_slice %324 {offsets = [0, 32], sizes = [2, 32], strides = [1, 1]} : vector<2x96xf32> to vector<2x32xf32>
    %327 = vector.extract_strided_slice %324 {offsets = [0, 64], sizes = [2, 32], strides = [1, 1]} : vector<2x96xf32> to vector<2x32xf32>
    %328 = vector.extract_strided_slice %316 {offsets = [0, 96], sizes = [2, 32], strides = [1, 1]} : vector<2x128xf32> to vector<2x32xf32>
    %329 = math.tanh %328 : vector<2x32xf32>
    %330 = arith.mulf %326, %310 : vector<2x32xf32>
    %331 = arith.mulf %325, %329 : vector<2x32xf32>
    %332 = arith.addf %330, %331 : vector<2x32xf32>
    %333 = math.tanh %332 : vector<2x32xf32>
    %334 = arith.mulf %327, %333 : vector<2x32xf32>
    %c10_102 = arith.constant 10 : index
    %c0_103 = arith.constant 0 : index
    %335 = vector.load %arg14[%c10_102, %c0_103] : memref<16x32xf32, #tpu.memory_space<vmem>>, vector<2x32xf32>
    tpu.vector_store %arg14[%c10_102, %c0_103], %334 {strides = array<i32>} : memref<16x32xf32, #tpu.memory_space<vmem>>, vector<2x32xf32>,
    %336 = vector.extract_strided_slice %200 {offsets = [12, 0], sizes = [2, 128], strides = [1, 1]} : vector<16x128xf32> to vector<2x128xf32>
    %cst_104 = arith.constant dense<0.000000e+00> : vector<2x128xf32>
    %337 = tpu.matmul %334, %201, %cst_104 {dimension_numbers = #tpu.dot_dimension_numbers<[1], [0], [0], [1], [0, 0, 1, 1], [], []>} : vector<2x32xf32>, vector<32x128xf32>, vector<2x128xf32> -> vector<2x128xf32>
    %338 = arith.addf %336, %337 : vector<2x128xf32>
    %339 = vector.extract_strided_slice %338 {offsets = [0, 0], sizes = [2, 96], strides = [1, 1]} : vector<2x128xf32> to vector<2x96xf32>
    %cst_105 = arith.constant 0.000000e+00 : f32
    %340 = vector.broadcast %cst_105 : f32 to vector<2x96xf32>
    %341 = arith.subf %340, %339 : vector<2x96xf32>
    %342 = math.exp %341 : vector<2x96xf32>
    %cst_106 = arith.constant 1.000000e+00 : f32
    %343 = vector.broadcast %cst_106 : f32 to vector<2x96xf32>
    %344 = arith.addf %343, %342 : vector<2x96xf32>
    %cst_107 = arith.constant 1.000000e+00 : f32
    %345 = vector.broadcast %cst_107 : f32 to vector<2x96xf32>
    %346 = arith.divf %345, %344 : vector<2x96xf32>
    %347 = vector.extract_strided_slice %346 {offsets = [0, 0], sizes = [2, 32], strides = [1, 1]} : vector<2x96xf32> to vector<2x32xf32>
    %348 = vector.extract_strided_slice %346 {offsets = [0, 32], sizes = [2, 32], strides = [1, 1]} : vector<2x96xf32> to vector<2x32xf32>
    %349 = vector.extract_strided_slice %346 {offsets = [0, 64], sizes = [2, 32], strides = [1, 1]} : vector<2x96xf32> to vector<2x32xf32>
    %350 = vector.extract_strided_slice %338 {offsets = [0, 96], sizes = [2, 32], strides = [1, 1]} : vector<2x128xf32> to vector<2x32xf32>
    %351 = math.tanh %350 : vector<2x32xf32>
    %352 = arith.mulf %348, %332 : vector<2x32xf32>
    %353 = arith.mulf %347, %351 : vector<2x32xf32>
    %354 = arith.addf %352, %353 : vector<2x32xf32>
    %355 = math.tanh %354 : vector<2x32xf32>
    %356 = arith.mulf %349, %355 : vector<2x32xf32>
    %c12_108 = arith.constant 12 : index
    %c0_109 = arith.constant 0 : index
    %357 = vector.load %arg14[%c12_108, %c0_109] : memref<16x32xf32, #tpu.memory_space<vmem>>, vector<2x32xf32>
    tpu.vector_store %arg14[%c12_108, %c0_109], %356 {strides = array<i32>} : memref<16x32xf32, #tpu.memory_space<vmem>>, vector<2x32xf32>,
    %358 = vector.extract_strided_slice %200 {offsets = [14, 0], sizes = [2, 128], strides = [1, 1]} : vector<16x128xf32> to vector<2x128xf32>
    %cst_110 = arith.constant dense<0.000000e+00> : vector<2x128xf32>
    %359 = tpu.matmul %356, %201, %cst_110 {dimension_numbers = #tpu.dot_dimension_numbers<[1], [0], [0], [1], [0, 0, 1, 1], [], []>} : vector<2x32xf32>, vector<32x128xf32>, vector<2x128xf32> -> vector<2x128xf32>
    %360 = arith.addf %358, %359 : vector<2x128xf32>
    %361 = vector.extract_strided_slice %360 {offsets = [0, 0], sizes = [2, 96], strides = [1, 1]} : vector<2x128xf32> to vector<2x96xf32>
    %cst_111 = arith.constant 0.000000e+00 : f32
    %362 = vector.broadcast %cst_111 : f32 to vector<2x96xf32>
    %363 = arith.subf %362, %361 : vector<2x96xf32>
    %364 = math.exp %363 : vector<2x96xf32>
    %cst_112 = arith.constant 1.000000e+00 : f32
    %365 = vector.broadcast %cst_112 : f32 to vector<2x96xf32>
    %366 = arith.addf %365, %364 : vector<2x96xf32>
    %cst_113 = arith.constant 1.000000e+00 : f32
    %367 = vector.broadcast %cst_113 : f32 to vector<2x96xf32>
    %368 = arith.divf %367, %366 : vector<2x96xf32>
    %369 = vector.extract_strided_slice %368 {offsets = [0, 0], sizes = [2, 32], strides = [1, 1]} : vector<2x96xf32> to vector<2x32xf32>
    %370 = vector.extract_strided_slice %368 {offsets = [0, 32], sizes = [2, 32], strides = [1, 1]} : vector<2x96xf32> to vector<2x32xf32>
    %371 = vector.extract_strided_slice %368 {offsets = [0, 64], sizes = [2, 32], strides = [1, 1]} : vector<2x96xf32> to vector<2x32xf32>
    %372 = vector.extract_strided_slice %360 {offsets = [0, 96], sizes = [2, 32], strides = [1, 1]} : vector<2x128xf32> to vector<2x32xf32>
    %373 = math.tanh %372 : vector<2x32xf32>
    %374 = arith.mulf %370, %354 : vector<2x32xf32>
    %375 = arith.mulf %369, %373 : vector<2x32xf32>
    %376 = arith.addf %374, %375 : vector<2x32xf32>
    %377 = math.tanh %376 : vector<2x32xf32>
    %378 = arith.mulf %371, %377 : vector<2x32xf32>
    %c14_114 = arith.constant 14 : index
    %c0_115 = arith.constant 0 : index
    %379 = vector.load %arg14[%c14_114, %c0_115] : memref<16x32xf32, #tpu.memory_space<vmem>>, vector<2x32xf32>
    tpu.vector_store %arg14[%c14_114, %c0_115], %378 {strides = array<i32>} : memref<16x32xf32, #tpu.memory_space<vmem>>, vector<2x32xf32>,
    %c0_116 = arith.constant 0 : index
    %c0_117 = arith.constant 0 : index
    %380 = vector.load %arg14[%c0_116, %c0_117] : memref<16x32xf32, #tpu.memory_space<vmem>>, vector<16x32xf32>
    %c0_118 = arith.constant 0 : index
    %c0_119 = arith.constant 0 : index
    %381 = vector.load %arg9[%c0_118, %c0_119] : memref<32x80xf32, #tpu.memory_space<vmem>>, vector<32x80xf32>
    %cst_120 = arith.constant dense<0.000000e+00> : vector<16x80xf32>
    %382 = tpu.matmul %380, %381, %cst_120 {dimension_numbers = #tpu.dot_dimension_numbers<[1], [0], [0], [1], [0, 0, 1, 1], [], []>} : vector<16x32xf32>, vector<32x80xf32>, vector<16x80xf32> -> vector<16x80xf32>
    %c0_121 = arith.constant 0 : index
    %c0_122 = arith.constant 0 : index
    %383 = vector.load %arg10[%c0_121, %c0_122] : memref<1x80xf32, #tpu.memory_space<vmem>>, vector<1x80xf32>
    %384 = vector.broadcast %383 : vector<1x80xf32> to vector<16x80xf32>
    %385 = arith.addf %382, %384 : vector<16x80xf32>
    %cst_123 = arith.constant 0.000000e+00 : f32
    %386 = vector.broadcast %cst_123 : f32 to vector<16x80xf32>
    %387 = arith.cmpf ogt, %385, %386 : vector<16x80xf32>
    %cst_124 = arith.constant 0.00999999977 : f32
    %388 = vector.broadcast %cst_124 : f32 to vector<16x80xf32>
    %389 = arith.mulf %388, %385 : vector<16x80xf32>
    %390 = arith.select %387, %385, %389 : vector<16x80xi1>, vector<16x80xf32>
    %c0_125 = arith.constant 0 : index
    %c0_126 = arith.constant 0 : index
    %391 = vector.load %arg11[%c0_125, %c0_126] : memref<80x8xf32, #tpu.memory_space<vmem>>, vector<80x8xf32>
    %cst_127 = arith.constant dense<0.000000e+00> : vector<16x8xf32>
    %392 = tpu.matmul %390, %391, %cst_127 {dimension_numbers = #tpu.dot_dimension_numbers<[1], [0], [0], [1], [0, 0, 1, 1], [], []>} : vector<16x80xf32>, vector<80x8xf32>, vector<16x8xf32> -> vector<16x8xf32>
    %c0_128 = arith.constant 0 : index
    %c0_129 = arith.constant 0 : index
    %393 = vector.load %arg12[%c0_128, %c0_129] : memref<1x8xf32, #tpu.memory_space<vmem>>, vector<1x8xf32>
    %394 = vector.broadcast %393 : vector<1x8xf32> to vector<16x8xf32>
    %395 = arith.addf %392, %394 : vector<16x8xf32>
    %c0_130 = arith.constant 0 : index
    %c0_131 = arith.constant 0 : index
    %396 = vector.load %arg13[%c0_130, %c0_131] : memref<16x8xf32, #tpu.memory_space<vmem>>, vector<16x8xf32>
    tpu.vector_store %arg13[%c0_130, %c0_131], %395 {strides = array<i32>} : memref<16x8xf32, #tpu.memory_space<vmem>>, vector<16x8xf32>,
    return
  }
}

</mosaic_0001>

<bundles_post_ra>
// kernel: simple_rnn_forward.1
= control target key start
LH: loop header
LB: loop body
LE: loop exit
PB: predicated region body
PF: predicated region fallthrough
CT: control target
= control target key end

     0   :  { %vm55_vm0 = vcmask 130048   ;;  %v2801_v8 = vmov 0.0   ;;  %vm2802_vm1 = vmmov 0   ;;  %vm154_vm4 = vcmask 261120   ;;  %s2803_s14 = smov 32   ;;  %s3342_s1 = inlined_call_operand.vmem [shape: f32[16,32], index: 1, kind: input, shape index: {}]   ;;  %s3343_s0 = inlined_call_operand.vmem [shape: f32[16,16], index: 0, kind: input, shape index: {}]   ;;  %s3344_s3 = inlined_call_operand.vmem [shape: f32[32,128], index: 3, kind: input, shape index: {}]   ;;  %s3345_s4 = inlined_call_operand.vmem [shape: f32[32,128], index: 4, kind: input, shape index: {}]   ;;  %s3346_s2 = inlined_call_operand.vmem [shape: f32[1,32], index: 2, kind: input, shape index: {}]   ;;  %s3347_s5 = inlined_call_operand.vmem [shape: f32[1,128], index: 5, kind: input, shape index: {}]   ;;  %s3348_s6 = inlined_call_operand.vmem [shape: f32[32,128], index: 6, kind: input, shape index: {}]   ;;  %s3349_s7 = inlined_call_operand.vmem [shape: f32[32,128], index: 7, kind: input, shape index: {}]   ;;  %s3350_s8 = inlined_call_operand.vmem [shape: f32[1,128], index: 8, kind: input, shape index: {}]   ;;  %s3351_s9 = inlined_call_operand.vmem [shape: f32[32,80], index: 9, kind: input, shape index: {}]   ;;  %s3352_s11 = inlined_call_operand.vmem [shape: f32[80,8], index: 11, kind: input, shape index: {}]   ;;  %s3353_s10 = inlined_call_operand.vmem [shape: f32[1,80], index: 10, kind: input, shape index: {}]   ;;  %s3354_s12 = inlined_call_operand.vmem [shape: f32[1,8], index: 12, kind: input, shape index: {}]   ;;  %s3355_s13 = inlined_call_operand.vmem [shape: f32[16,8], index: 13, kind: output, shape index: {}]  }
   0x1   :  { %v47_v0 = vld [vmem:[%s3342_s1 + $0x8] sm:$0xff]  ;;  %v46_v1 = vld [vmem:[%s3342_s1] sm:$0xff]  ;;  %v146_v4 = vld [vmem:[%s3344_s3 + $0x18] sm:$0xff]  ;;  %vm342_vm5 = vcmask 254976   ;;  %vm451_vm6 = vcmask 257026   ;;  %vm675_vm7 = vcmask 261126  }
   0x2   :  { %v44_v2 = vld [vmem:[%s3343_s0] sm:$0xff]  ;;  %2430 = vmatprep.subr.mxu0 %v47_v0  ;;  %v45_v3 = vld [vmem:[%s3343_s0 + $0x8] sm:$0xff]  ;;  %2437 = vmatprep.subr.mxu1 %v146_v4  ;;  %v145_v5 = vld [vmem:[%s3344_s3 + $0x10] sm:$0xff]  ;;  %vm563_vm8 = vcmask 259076   ;;  %vm2198_vm11 = vcmask 654336   ;;  %vm2280_vm12 = vcmask 64512  }
   0x3   :  { %2434 = vmatprep.mubr.msk.f32.mxu0 %vm55_vm0, %v44_v2  ;;  %2431 = vmatpush3.msra.mxu0 %v47_v0  ;;  %v144_v6 = vld [vmem:[%s3344_s3 + $0x8] sm:$0xff]  ;;  %v143_v7 = vld [vmem:[%s3344_s3] sm:$0xff]  ;;  %v2903_v9 = vld [vmem:[%s3345_s4 + $0x18] sm:$0xff] }
   0x4   :  { %2432 = vmatprep.subr.mxu0 %v46_v1  ;;  %2438 = vmatpush3.msra.mxu1 %v146_v4  ;;  %v2911_v10 = vld [vmem:[%s3345_s4 + $0x10] sm:$0xff]  ;;  %v2917_v11 = vld [vmem:[%s3345_s4 + $0x8] sm:$0xff]  ;;  %v2924_v12 = vld [vmem:[%s3345_s4] sm:$0xff] }
   0x5   :  { %2433 = vmatpush3.msra.mxu0 %v46_v1  ;;  %2439 = vmatprep.subr.mxu1 %v145_v5  ;;  %v2287_v13 = vld [vmem:[%s3346_s2] ss:$0 sm:$0xff] }
   0x6   :  { %2435 = vmatmul.mubr.msk.f32.vlgmr.msra.gmra.mxu0 %vm55_vm0, %v45_v3  ;;  %2440 = vmatpush3.msra.mxu1 %v145_v5  ;;  %v2290_v22 = vld [vmem:[%s3347_s5] ss:$0 sm:$0xff]  ;;  %s2804_s5 = smov 64  }
   0x7   :  { %2441 = vmatprep.subr.mxu1 %v144_v6  ;;  %2470 = vmatprep.subr.mxu0 %v2801_v8 }
   0x8   :  { %2442 = vmatpush3.msra.mxu1 %v144_v6  ;;  %2471 = vmatpush3.msra.mxu0 %v2903_v9 }
   0x9   :  { %2443 = vmatprep.subr.mxu1 %v143_v7  ;;  %2472 = vmatprep.subr.mxu0 %v2801_v8 }
   0xa   :  { %2444 = vmatpush3.msra.mxu1 %v143_v7  ;;  %2473 = vmatpush3.msra.mxu0 %v2911_v10 }
   0xb   :  { %2448 = vmatprep.subr.mxu1 %v2801_v8  ;;  %2474 = vmatprep.subr.mxu0 %v2801_v8 }
   0xc   :  { %2475 = vmatpush3.msra.mxu0 %v2917_v11  ;;  %2478 = vmatprep.mubr.msk.f32.mxu0 %vm2802_vm1, %v2801_v8 }
   0xd   :  { %2476 = vmatprep.subr.mxu0 %v2801_v8 }
   0xe   :  { %2477 = vmatpush3.msra.mxu0 %v2924_v12 }
   0xf   :  { %2492 = vmatprep.subr.mxu0 %v2801_v8 }
  0xc6   :  { %v2436_v14 = vpop.f32.mrf.mxu0 }
  0xc7   :  { %v134_v15 = vadd.f32 %v2436_v14, %v2287_v13 }
  0xc8   :  { %v128_v16 = vpop.f32.mrf.mxu0 }
  0xc9   :  { %v129_v17 = vadd.f32 %v2287_v13, %v128_v16  ;;  %v140_v18 = vmul.f32 0.01, %v134_v15  ;;  %vm138_vm2 = vcmp.gt.f32.partialorder %v134_v15, 0.0 }
  0xcb   :  { %vm137_vm3 = vcmp.gt.f32.partialorder %v129_v17, 0.0  ;;  %v139_v19 = vmul.f32 0.01, %v129_v17  ;;  %v142_v21 = vsel %vm138_vm2, %v134_v15, %v140_v18 }
  0xcd   :  { %v141_v20 = vsel %vm137_vm3, %v129_v17, %v139_v19 }
  0xce   :  { %2445 = vmatprep.mubr.msk.f32.mxu1 %vm154_vm4, %v141_v20 }
  0xcf   :  { %2446 = vmatmul.mubr.msk.f32.vlgmr.msra.gmra.mxu1 %vm154_vm4, %v142_v21 }
  0xd0   :  { %2449 = vmatpush3.msra.mxu1 %v2903_v9  ;;  %2456 = vmatprep.mubr.msk.f32.mxu1 %vm2802_vm1, %v2801_v8 }
  0xd1   :  { %2450 = vmatprep.subr.mxu1 %v2801_v8 }
  0xd2   :  { %2451 = vmatpush3.msra.mxu1 %v2911_v10 }
  0xd3   :  { %2452 = vmatprep.subr.mxu1 %v2801_v8 }
  0xd4   :  { %2453 = vmatpush3.msra.mxu1 %v2917_v11 }
  0xd5   :  { %2454 = vmatprep.subr.mxu1 %v2801_v8 }
  0xd6   :  { %2455 = vmatpush3.msra.mxu1 %v2924_v12 }
  0xd7   :  { %2457 = vmatmul.mubr.f32.vlgmr.msra.gmra.mxu1 %v2801_v8  ;;  %2459 = vmatprep.subr.mxu1 %v2801_v8 }
  0xd8   :  { %2460 = vmatpush3.msra.mxu1 %v2903_v9  ;;  %2467 = vmatprep.mubr.msk.f32.mxu1 %vm2802_vm1, %v2801_v8 }
  0xd9   :  { %2461 = vmatprep.subr.mxu1 %v2801_v8 }
  0xda   :  { %2462 = vmatpush3.msra.mxu1 %v2911_v10 }
  0xdb   :  { %2463 = vmatprep.subr.mxu1 %v2801_v8 }
  0xdc   :  { %2464 = vmatpush3.msra.mxu1 %v2917_v11 }
  0xdd   :  { %2465 = vmatprep.subr.mxu1 %v2801_v8 }
  0xde   :  { %2466 = vmatpush3.msra.mxu1 %v2924_v12 }
  0xdf   :  { %2481 = vmatprep.subr.mxu1 %v2801_v8 }
 0x18f   :  { %v2447_v23 = vpop.f32.mrf.mxu1 }
 0x190   :  { %v2960_v24 = vadd.f32 %v2447_v23, %v2290_v22 }
 0x191   :  { %v227_v25 = vpop.f32.mrf.mxu1 }
 0x192   :  { %v2962_v26 = vadd.f32 %v2290_v22, %v227_v25 }
 0x197   :  { %v309_v27 = vpop.f32.mrf.mxu1 }
 0x198   :  { %v313_v28 = vadd.f32 %v309_v27, %v2962_v26 }
 0x199   :  { %v2458_v29 = vpop.f32.mrf.mxu1 }
 0x19a   :  { %2673 = vtanh.f32 %v313_v28  ;;  %v314_v31 = vsub.f32 0.0, %v313_v28 }
 0x19c   :  { %v315_v32 = vmul.f32 1.442695, %v314_v31 }
 0x19e   :  { %2675 = vpow2.f32 %v315_v32 }
 0x1a7   :  { %v2674_v30 = vpop.eup %2673 }
 0x1a8   :  { %323 = vrot.lane.b32.xlu0 %v2674_v30, %s2803_s14 }
 0x1ab   :  { %v2676_v33 = vpop.eup %2675 }
 0x1ac   :  { %v317_v34 = vadd.f32 1.0, %v2676_v33 }
 0x1ae   :  { %2677 = vrcp.f32 %v317_v34 }
 0x1bb   :  { %v2678_v35 = vpop.eup %2677 }
 0x1bc   :  { %v321_v38 = vmul.f32 0.0, %v2678_v35 }
 0x21a   :  { %v324_v36 = vpop.permute.xlu0 %323 }
 0x21b   :  { %v326_v37 = vmul.f32 %v2678_v35, %v324_v36 }
 0x21d   :  { %328 = vrot.lane.b32.xlu0 %v326_v37, %s2803_s14 }
 0x28f   :  { %v329_v39 = vpop.permute.xlu0 %328 }
 0x290   :  { %v331_v40 = vadd.f32 %v329_v39, %v321_v38 }
 0x292   :  { %2679 = vtanh.f32 %v331_v40  ;;  %v428_v57 = vrot.slane %v331_v40, 6 }
 0x29f   :  { %v2680_v41 = vpop.eup %2679 }
 0x2a0   :  { %334 = vrot.lane.b32.xlu1 %v2680_v41, %s2803_s14 }
 0x312   :  { %v335_v42 = vpop.permute.xlu1 %334 }
 0x313   :  { %v337_v43 = vmul.f32 %v2678_v35, %v335_v42 }
 0x315   :  { %339 = vrot.lane.b32.xlu1 %v337_v43, %s2804_s5 }
 0x387   :  { %v340_v44 = vpop.permute.xlu1 %339 }
 0x388   :  { %343 = vst.msk [vmem:[#allocation2] sm:$0x3] %vm342_vm5, %v340_v44  ;;  %2468 = vmatmul.mubr.msk.f32.vlgmr.msra.gmra.mxu1 %vm154_vm4, %v340_v44 }
 0x389   :  { %2482 = vmatpush3.msra.mxu1 %v2903_v9  ;;  %2489 = vmatprep.mubr.msk.f32.mxu1 %vm2802_vm1, %v2801_v8 }
 0x38a   :  { %2483 = vmatprep.subr.mxu1 %v2801_v8 }
 0x38b   :  { %2484 = vmatpush3.msra.mxu1 %v2911_v10 }
 0x38c   :  { %2485 = vmatprep.subr.mxu1 %v2801_v8 }
 0x38d   :  { %2486 = vmatpush3.msra.mxu1 %v2917_v11 }
 0x38e   :  { %2487 = vmatprep.subr.mxu1 %v2801_v8 }
 0x38f   :  { %2488 = vmatpush3.msra.mxu1 %v2924_v12 }
 0x390   :  { %2503 = vmatprep.subr.mxu1 %v2801_v8 }
 0x448   :  { %v412_v45 = vpop.f32.mrf.mxu1 }
 0x449   :  { %v417_v46 = vrot.slane %v412_v45, 6 }
 0x44a   :  { %v2469_v47 = vpop.f32.mrf.mxu1 }
 0x44b   :  { %v419_v48 = vadd.f32 %v417_v46, %v2962_v26 }
 0x44d   :  { %2681 = vtanh.f32 %v419_v48  ;;  %v420_v50 = vsub.f32 0.0, %v419_v48 }
 0x44f   :  { %v421_v51 = vmul.f32 1.442695, %v420_v50 }
 0x451   :  { %2683 = vpow2.f32 %v421_v51 }
 0x45a   :  { %v2682_v49 = vpop.eup %2681 }
 0x45b   :  { %432 = vrot.lane.b32.xlu0 %v2682_v49, %s2803_s14 }
 0x45e   :  { %v2684_v52 = vpop.eup %2683 }
 0x45f   :  { %v423_v53 = vadd.f32 1.0, %v2684_v52 }
 0x461   :  { %2685 = vrcp.f32 %v423_v53 }
 0x46e   :  { %v2686_v54 = vpop.eup %2685 }
 0x46f   :  { %v430_v58 = vmul.f32 %v2686_v54, %v428_v57 }
 0x4cd   :  { %v433_v55 = vpop.permute.xlu0 %432 }
 0x4ce   :  { %v435_v56 = vmul.f32 %v2686_v54, %v433_v55 }
 0x4d0   :  { %437 = vrot.lane.b32.xlu1 %v435_v56, %s2803_s14 }
 0x542   :  { %v438_v59 = vpop.permute.xlu1 %437 }
 0x543   :  { %v440_v60 = vadd.f32 %v438_v59, %v430_v58 }
 0x545   :  { %2687 = vtanh.f32 %v440_v60  ;;  %v540_v19 = vrot.slane %v440_v60, 6 }
 0x552   :  { %v2688_v61 = vpop.eup %2687 }
 0x553   :  { %443 = vrot.lane.b32.xlu0 %v2688_v61, %s2803_s14 }
 0x5c5   :  { %v444_v62 = vpop.permute.xlu0 %443 }
 0x5c6   :  { %v2985_v63 = vmul.f32 %v2686_v54, %v444_v62 }
 0x5c8   :  { %v453_v0 = vrot.slane %v2985_v63, 2 }
 0x5ca   :  { %454 = vrot.lane.b32.xlu1 %v453_v0, %s2804_s5 }
 0x63c   :  { %v455_v1 = vpop.permute.xlu1 %454 }
 0x63d   :  { %2479 = vmatmul.mubr.msk.f32.vlgmr.msra.gmra.mxu0 %vm154_vm4, %v455_v1 }
 0x63e   :  { %2493 = vmatpush3.msra.mxu0 %v2903_v9  ;;  %2500 = vmatprep.mubr.msk.f32.mxu0 %vm2802_vm1, %v2801_v8 }
 0x63f   :  { %2494 = vmatprep.subr.mxu0 %v2801_v8 }
 0x640   :  { %2495 = vmatpush3.msra.mxu0 %v2911_v10 }
 0x641   :  { %2496 = vmatprep.subr.mxu0 %v2801_v8 }
 0x642   :  { %2497 = vmatpush3.msra.mxu0 %v2917_v11 }
 0x643   :  { %2498 = vmatprep.subr.mxu0 %v2801_v8 }
 0x644   :  { %2499 = vmatpush3.msra.mxu0 %v2924_v12 }
 0x645   :  { %2514 = vmatprep.subr.mxu0 %v2801_v8 }
 0x6fd   :  { %v524_v2 = vpop.f32.mrf.mxu0 }
 0x6fe   :  { %v529_v3 = vrot.slane %v524_v2, 4 }
 0x6ff   :  { %v2480_v4 = vpop.f32.mrf.mxu0 }
 0x700   :  { %v531_v5 = vadd.f32 %v529_v3, %v2962_v26 }
 0x702   :  { %2689 = vtanh.f32 %v531_v5  ;;  %v532_v7 = vsub.f32 0.0, %v531_v5 }
 0x704   :  { %v533_v13 = vmul.f32 1.442695, %v532_v7 }
 0x706   :  { %2691 = vpow2.f32 %v533_v13 }
 0x70f   :  { %v2690_v6 = vpop.eup %2689 }
 0x710   :  { %544 = vrot.lane.b32.xlu0 %v2690_v6, %s2803_s14 }
 0x713   :  { %v2692_v14 = vpop.eup %2691 }
 0x714   :  { %v535_v15 = vadd.f32 1.0, %v2692_v14 }
 0x716   :  { %2693 = vrcp.f32 %v535_v15 }
 0x723   :  { %v2694_v16 = vpop.eup %2693 }
 0x724   :  { %v542_v20 = vmul.f32 %v2694_v16, %v540_v19 }
 0x782   :  { %v545_v17 = vpop.permute.xlu0 %544 }
 0x783   :  { %v547_v18 = vmul.f32 %v2694_v16, %v545_v17 }
 0x785   :  { %549 = vrot.lane.b32.xlu1 %v547_v18, %s2803_s14 }
 0x7f7   :  { %v550_v21 = vpop.permute.xlu1 %549 }
 0x7f8   :  { %v552_v22 = vadd.f32 %v550_v21, %v542_v20 }
 0x7fa   :  { %2695 = vtanh.f32 %v552_v22  ;;  %v652_v42 = vrot.slane %v552_v22, 6 }
 0x807   :  { %v2696_v23 = vpop.eup %2695 }
 0x808   :  { %555 = vrot.lane.b32.xlu0 %v2696_v23, %s2803_s14 }
 0x87a   :  { %v556_v25 = vpop.permute.xlu0 %555 }
 0x87b   :  { %v3004_v27 = vmul.f32 %v2694_v16, %v556_v25 }
 0x87d   :  { %v565_v28 = vrot.slane %v3004_v27, 4 }
 0x87f   :  { %566 = vrot.lane.b32.xlu1 %v565_v28, %s2804_s5 }
 0x8f1   :  { %v567_v29 = vpop.permute.xlu1 %566 }
 0x8f2   :  { %2490 = vmatmul.mubr.msk.f32.vlgmr.msra.gmra.mxu1 %vm154_vm4, %v567_v29 }
 0x8f3   :  { %2504 = vmatpush3.msra.mxu1 %v2903_v9  ;;  %2511 = vmatprep.mubr.msk.f32.mxu1 %vm2802_vm1, %v2801_v8 }
 0x8f4   :  { %2505 = vmatprep.subr.mxu1 %v2801_v8 }
 0x8f5   :  { %2506 = vmatpush3.msra.mxu1 %v2911_v10 }
 0x8f6   :  { %2507 = vmatprep.subr.mxu1 %v2801_v8 }
 0x8f7   :  { %2508 = vmatpush3.msra.mxu1 %v2917_v11 }
 0x8f8   :  { %2509 = vmatprep.subr.mxu1 %v2801_v8 }
 0x8f9   :  { %2510 = vmatpush3.msra.mxu1 %v2924_v12 }
 0x8fa   :  { %2525 = vmatprep.subr.mxu1 %v2801_v8 }
 0x9b2   :  { %v636_v30 = vpop.f32.mrf.mxu1 }
 0x9b3   :  { %v641_v31 = vrot.slane %v636_v30, 2 }
 0x9b4   :  { %v2491_v32 = vpop.f32.mrf.mxu1 }
 0x9b5   :  { %v643_v33 = vadd.f32 %v641_v31, %v2962_v26 }
 0x9b7   :  { %2697 = vtanh.f32 %v643_v33  ;;  %v644_v35 = vsub.f32 0.0, %v643_v33 }
 0x9b9   :  { %v645_v36 = vmul.f32 1.442695, %v644_v35 }
 0x9bb   :  { %2699 = vpow2.f32 %v645_v36 }
 0x9c4   :  { %v2698_v34 = vpop.eup %2697 }
 0x9c5   :  { %656 = vrot.lane.b32.xlu0 %v2698_v34, %s2803_s14 }
 0x9c8   :  { %v2700_v37 = vpop.eup %2699 }
 0x9c9   :  { %v647_v38 = vadd.f32 1.0, %v2700_v37 }
 0x9cb   :  { %2701 = vrcp.f32 %v647_v38 }
 0x9d8   :  { %v2702_v39 = vpop.eup %2701 }
 0x9d9   :  { %v654_v43 = vmul.f32 %v2702_v39, %v652_v42 }
 0xa37   :  { %v657_v40 = vpop.permute.xlu0 %656 }
 0xa38   :  { %v659_v41 = vmul.f32 %v2702_v39, %v657_v40 }
 0xa3a   :  { %661 = vrot.lane.b32.xlu1 %v659_v41, %s2803_s14 }
 0xaac   :  { %v662_v44 = vpop.permute.xlu1 %661 }
 0xaad   :  { %v664_v45 = vadd.f32 %v662_v44, %v654_v43 }
 0xaaf   :  { %2703 = vtanh.f32 %v664_v45  ;;  %v761_v61 = vrot.slane %v664_v45, 6 }
 0xabc   :  { %v2704_v26 = vpop.eup %2703 }
 0xabd   :  { %667 = vrot.lane.b32.xlu0 %v2704_v26, %s2803_s14 }
 0xb2f   :  { %v668_v46 = vpop.permute.xlu0 %667 }
 0xb30   :  { %v3023_v47 = vmul.f32 %v2702_v39, %v668_v46 }
 0xb32   :  { %v677_v48 = vrot.slane %v3023_v47, 6 }
 0xb34   :  { %678 = vrot.lane.b32.xlu1 %v677_v48, %s2804_s5 }
 0xba6   :  { %v679_v49 = vpop.permute.xlu1 %678 }
 0xba7   :  { %2501 = vmatmul.mubr.msk.f32.vlgmr.msra.gmra.mxu0 %vm154_vm4, %v679_v49 }
 0xba8   :  { %2515 = vmatpush3.msra.mxu0 %v2903_v9  ;;  %2522 = vmatprep.mubr.msk.f32.mxu0 %vm2802_vm1, %v2801_v8 }
 0xba9   :  { %2516 = vmatprep.subr.mxu0 %v2801_v8 }
 0xbaa   :  { %2517 = vmatpush3.msra.mxu0 %v2911_v10 }
 0xbab   :  { %2518 = vmatprep.subr.mxu0 %v2801_v8 }
 0xbac   :  { %2519 = vmatpush3.msra.mxu0 %v2917_v11 }
 0xbad   :  { %2520 = vmatprep.subr.mxu0 %v2801_v8 }
 0xbae   :  { %2521 = vmatpush3.msra.mxu0 %v2924_v12 }
 0xc67   :  { %v748_v50 = vpop.f32.mrf.mxu0 }
 0xc68   :  { %v752_v51 = vadd.f32 %v748_v50, %v2960_v24 }
 0xc69   :  { %v2502_v52 = vpop.f32.mrf.mxu0 }
 0xc6a   :  { %2705 = vtanh.f32 %v752_v51  ;;  %v753_v54 = vsub.f32 0.0, %v752_v51 }
 0xc6c   :  { %v754_v55 = vmul.f32 1.442695, %v753_v54 }
 0xc6e   :  { %2707 = vpow2.f32 %v754_v55 }
 0xc77   :  { %v2706_v53 = vpop.eup %2705 }
 0xc78   :  { %765 = vrot.lane.b32.xlu0 %v2706_v53, %s2803_s14 }
 0xc7b   :  { %v2708_v56 = vpop.eup %2707 }
 0xc7c   :  { %v756_v57 = vadd.f32 1.0, %v2708_v56 }
 0xc7e   :  { %2709 = vrcp.f32 %v756_v57 }
 0xc8b   :  { %v2710_v58 = vpop.eup %2709 }
 0xc8c   :  { %v763_v62 = vmul.f32 %v2710_v58, %v761_v61 }
 0xcea   :  { %v766_v59 = vpop.permute.xlu0 %765 }
 0xceb   :  { %v768_v60 = vmul.f32 %v2710_v58, %v766_v59 }
 0xced   :  { %770 = vrot.lane.b32.xlu1 %v768_v60, %s2803_s14 }
 0xd5f   :  { %v771_v0 = vpop.permute.xlu1 %770 }
 0xd60   :  { %v773_v1 = vadd.f32 %v771_v0, %v763_v62 }
 0xd62   :  { %2711 = vtanh.f32 %v773_v1  ;;  %v869_v19 = vrot.slane %v773_v1, 6 }
 0xd6f   :  { %v2712_v2 = vpop.eup %2711 }
 0xd70   :  { %776 = vrot.lane.b32.xlu0 %v2712_v2, %s2803_s14 }
 0xde2   :  { %v777_v3 = vpop.permute.xlu0 %776 }
 0xde3   :  { %v779_v4 = vmul.f32 %v2710_v58, %v777_v3 }
 0xde5   :  { %781 = vrot.lane.b32.xlu1 %v779_v4, %s2804_s5 }
 0xe57   :  { %v782_v5 = vpop.permute.xlu1 %781 }
 0xe58   :  { %784 = vst.msk [vmem:[#allocation2 + $0x8] sm:$0x3] %vm342_vm5, %v782_v5  ;;  %2512 = vmatmul.mubr.msk.f32.vlgmr.msra.gmra.mxu1 %vm154_vm4, %v782_v5 }
 0xe59   :  { %2526 = vmatpush3.msra.mxu1 %v2903_v9  ;;  %2533 = vmatprep.mubr.msk.f32.mxu1 %vm2802_vm1, %v2801_v8 }
 0xe5a   :  { %2527 = vmatprep.subr.mxu1 %v2801_v8 }
 0xe5b   :  { %2528 = vmatpush3.msra.mxu1 %v2911_v10 }
 0xe5c   :  { %2529 = vmatprep.subr.mxu1 %v2801_v8 }
 0xe5d   :  { %2530 = vmatpush3.msra.mxu1 %v2917_v11 }
 0xe5e   :  { %2531 = vmatprep.subr.mxu1 %v2801_v8 }
 0xe5f   :  { %2532 = vmatpush3.msra.mxu1 %v2924_v12 }
 0xe60   :  { %2547 = vmatprep.subr.mxu1 %v2801_v8 }
 0xf18   :  { %v853_v6 = vpop.f32.mrf.mxu1 }
 0xf19   :  { %v858_v7 = vrot.slane %v853_v6, 6  ;;  %v1120_v6 = vld [vmem:[%s3348_s6 + $0x18] sm:$0xff] }
 0xf1a   :  { %v2513_v9 = vpop.f32.mrf.mxu1  ;;  %2536 = vmatprep.subr.mxu0 %v1120_v6 }
 0xf1b   :  { %v860_v13 = vadd.f32 %v858_v7, %v2960_v24  ;;  %v1119_v7 = vld [vmem:[%s3348_s6 + $0x10] sm:$0xff]  ;;  %v3096_v9 = vld [vmem:[%s3349_s7 + $0x18] sm:$0xff] }
 0xf1d   :  { %2713 = vtanh.f32 %v860_v13  ;;  %v861_v10 = vsub.f32 0.0, %v860_v13  ;;  %v3104_v13 = vld [vmem:[%s3349_s7 + $0x10] sm:$0xff] }
 0xf1f   :  { %v862_v15 = vmul.f32 1.442695, %v861_v10  ;;  %v3114_v10 = vld [vmem:[%s3349_s7 + $0x8] sm:$0xff] }
 0xf21   :  { %2715 = vpow2.f32 %v862_v15  ;;  %v3123_v15 = vld [vmem:[%s3349_s7] sm:$0xff] }
 0xf2a   :  { %v2714_v14 = vpop.eup %2713 }
 0xf2b   :  { %873 = vrot.lane.b32.xlu0 %v2714_v14, %s2803_s14  ;;  %v1117_v14 = vld [vmem:[%s3348_s6] sm:$0xff] }
 0xf2e   :  { %v2716_v16 = vpop.eup %2715 }
 0xf2f   :  { %v864_v11 = vadd.f32 1.0, %v2716_v16 }
 0xf31   :  { %2717 = vrcp.f32 %v864_v11 }
 0xf3e   :  { %v2718_v17 = vpop.eup %2717 }
 0xf3f   :  { %v871_v20 = vmul.f32 %v2718_v17, %v869_v19 }
 0xf9d   :  { %v874_v18 = vpop.permute.xlu0 %873 }
 0xf9e   :  { %v876_v12 = vmul.f32 %v2718_v17, %v874_v18 }
 0xfa0   :  { %878 = vrot.lane.b32.xlu1 %v876_v12, %s2803_s14 }
0x1012   :  { %v879_v21 = vpop.permute.xlu1 %878 }
0x1013   :  { %v881_v22 = vadd.f32 %v879_v21, %v871_v20 }
0x1015   :  { %2719 = vtanh.f32 %v881_v22  ;;  %v980_v43 = vrot.slane %v881_v22, 6 }
0x1022   :  { %v2720_v23 = vpop.eup %2719 }
0x1023   :  { %884 = vrot.lane.b32.xlu0 %v2720_v23, %s2803_s14  ;;  %v2300_v23 = vld [vmem:[%s3350_s8] ss:$0 sm:$0xff] }
0x1095   :  { %v885_v25 = vpop.permute.xlu0 %884 }
0x1096   :  { %v3058_v28 = vmul.f32 %v2718_v17, %v885_v25 }
0x1098   :  { %v893_v29 = vrot.slane %v3058_v28, 2 }
0x109a   :  { %894 = vrot.lane.b32.xlu1 %v893_v29, %s2804_s5 }
0x110c   :  { %v895_v30 = vpop.permute.xlu1 %894 }
0x110d   :  { %2523 = vmatmul.mubr.msk.f32.vlgmr.msra.gmra.mxu0 %vm154_vm4, %v895_v30 }
0x110e   :  { %2537 = vmatpush3.msra.mxu0 %v1120_v6 }
0x110f   :  { %2538 = vmatprep.subr.mxu0 %v1119_v7 }
0x1110   :  { %2539 = vmatpush3.msra.mxu0 %v1119_v7 }
0x11cd   :  { %v964_v31 = vpop.f32.mrf.mxu0 }
0x11ce   :  { %v969_v32 = vrot.slane %v964_v31, 4 }
0x11cf   :  { %v2524_v33 = vpop.f32.mrf.mxu0 }
0x11d0   :  { %v971_v34 = vadd.f32 %v969_v32, %v2960_v24 }
0x11d2   :  { %2721 = vtanh.f32 %v971_v34  ;;  %v972_v36 = vsub.f32 0.0, %v971_v34 }
0x11d4   :  { %v973_v37 = vmul.f32 1.442695, %v972_v36 }
0x11d6   :  { %2723 = vpow2.f32 %v973_v37 }
0x11df   :  { %v2722_v35 = vpop.eup %2721 }
0x11e0   :  { %984 = vrot.lane.b32.xlu0 %v2722_v35, %s2803_s14 }
0x11e3   :  { %v2724_v38 = vpop.eup %2723 }
0x11e4   :  { %v975_v39 = vadd.f32 1.0, %v2724_v38 }
0x11e6   :  { %2725 = vrcp.f32 %v975_v39 }
0x11f3   :  { %v2726_v40 = vpop.eup %2725 }
0x11f4   :  { %v982_v44 = vmul.f32 %v2726_v40, %v980_v43 }
0x1252   :  { %v985_v41 = vpop.permute.xlu0 %984 }
0x1253   :  { %v987_v42 = vmul.f32 %v2726_v40, %v985_v41 }
0x1255   :  { %989 = vrot.lane.b32.xlu1 %v987_v42, %s2803_s14 }
0x12c7   :  { %v990_v45 = vpop.permute.xlu1 %989 }
0x12c8   :  { %v992_v26 = vadd.f32 %v990_v45, %v982_v44 }
0x12ca   :  { %2727 = vtanh.f32 %v992_v26 }
0x12d7   :  { %v2728_v46 = vpop.eup %2727 }
0x12d8   :  { %995 = vrot.lane.b32.xlu0 %v2728_v46, %s2803_s14 }
0x134a   :  { %v996_v48 = vpop.permute.xlu0 %995 }
0x134b   :  { %v998_v49 = vmul.f32 %v2726_v40, %v996_v48 }
0x134d   :  { %v1004_v50 = vrot.slane %v998_v49, 4 }
0x134f   :  { %1005 = vrot.lane.b32.xlu1 %v1004_v50, %s2804_s5 }
0x13c1   :  { %v1006_v51 = vpop.permute.xlu1 %1005 }
0x13c2   :  { %2534 = vmatmul.mubr.msk.f32.vlgmr.msra.gmra.mxu1 %vm154_vm4, %v1006_v51 }
0x13c3   :  { %2555 = vmatprep.mubr.msk.f32.mxu1 %vm2802_vm1, %v2801_v8  ;;  %2548 = vmatpush3.msra.mxu1 %v3096_v9 }
0x13c4   :  { %2549 = vmatprep.subr.mxu1 %v2801_v8 }
0x13c5   :  { %2550 = vmatpush3.msra.mxu1 %v3104_v13 }
0x13c6   :  { %2551 = vmatprep.subr.mxu1 %v2801_v8 }
0x13c7   :  { %2552 = vmatpush3.msra.mxu1 %v3114_v10 }
0x13c8   :  { %2553 = vmatprep.subr.mxu1 %v2801_v8 }
0x13c9   :  { %2554 = vmatpush3.msra.mxu1 %v3123_v15 }
0x13ca   :  { %2556 = vmatmul.mubr.f32.vlgmr.msra.gmra.mxu1 %v2801_v8  ;;  %2569 = vmatprep.subr.mxu1 %v2801_v8 }
0x13cb   :  { %2570 = vmatpush3.msra.mxu1 %v3096_v9  ;;  %2577 = vmatprep.mubr.msk.f32.mxu1 %vm2802_vm1, %v2801_v8 }
0x13cc   :  { %2571 = vmatprep.subr.mxu1 %v2801_v8 }
0x13cd   :  { %2572 = vmatpush3.msra.mxu1 %v3104_v13 }
0x13ce   :  { %2573 = vmatprep.subr.mxu1 %v2801_v8 }
0x13cf   :  { %2574 = vmatpush3.msra.mxu1 %v3114_v10 }
0x13d0   :  { %2575 = vmatprep.subr.mxu1 %v2801_v8 }
0x13d1   :  { %2576 = vmatpush3.msra.mxu1 %v3123_v15 }
0x13d2   :  { %2591 = vmatprep.subr.mxu1 %v2801_v8 }
0x1482   :  { %v1075_v52 = vpop.f32.mrf.mxu1 }
0x1483   :  { %v1080_v53 = vrot.slane %v1075_v52, 2 }
0x1484   :  { %v2535_v54 = vpop.f32.mrf.mxu1 }
0x1485   :  { %v1082_v55 = vadd.f32 %v1080_v53, %v2960_v24  ;;  %v1091_v24 = vrot.slane %v992_v26, 6 }
0x1487   :  { %2729 = vtanh.f32 %v1082_v55  ;;  %v1083_v57 = vsub.f32 0.0, %v1082_v55 }
0x1489   :  { %v1084_v58 = vmul.f32 1.442695, %v1083_v57 }
0x148a   :  { %v1279_v21 = vpop.f32.mrf.mxu1 }
0x148b   :  { %2731 = vpow2.f32 %v1084_v58 }
0x148c   :  { %v2557_v22 = vpop.f32.mrf.mxu1 }
0x1494   :  { %v2730_v56 = vpop.eup %2729 }
0x1495   :  { %1095 = vrot.lane.b32.xlu0 %v2730_v56, %s2803_s14 }
0x1498   :  { %v2732_v59 = vpop.eup %2731 }
0x1499   :  { %v1086_v60 = vadd.f32 1.0, %v2732_v59 }
0x149b   :  { %2733 = vrcp.f32 %v1086_v60 }
0x14a8   :  { %v2734_v61 = vpop.eup %2733 }
0x14a9   :  { %v1093_v1 = vmul.f32 %v2734_v61, %v1091_v24 }
0x1507   :  { %v1096_v62 = vpop.permute.xlu0 %1095 }
0x1508   :  { %v1098_v0 = vmul.f32 %v2734_v61, %v1096_v62 }
0x150a   :  { %1100 = vrot.lane.b32.xlu1 %v1098_v0, %s2803_s14 }
0x150e   :  { %448 = vrot.lane.b32.xlu1 %v2985_v63, %s2804_s5 }
0x1512   :  { %672 = vrot.lane.b32.xlu1 %v3023_v47, %s2804_s5 }
0x1516   :  { %1000 = vrot.lane.b32.xlu1 %v998_v49, %s2804_s5 }
0x157c   :  { %v1101_v2 = vpop.permute.xlu1 %1100 }
0x157d   :  { %v1103_v3 = vadd.f32 %v1101_v2, %v1093_v1 }
0x157f   :  { %2735 = vtanh.f32 %v1103_v3 }
0x1580   :  { %v449_v4 = vpop.permute.xlu1 %448 }
0x1581   :  { %452 = vst.msk [vmem:[#allocation2] sm:$0xc] %vm451_vm6, %v449_v4 }
0x1584   :  { %v673_v5 = vpop.permute.xlu1 %672 }
0x1585   :  { %676 = vst.msk [vmem:[#allocation2] sm:$0xc0] %vm675_vm7, %v673_v5 }
0x1588   :  { %v1001_v63 = vpop.permute.xlu1 %1000 }
0x1589   :  { %1003 = vst.msk [vmem:[#allocation2 + $0x8] sm:$0x30] %vm563_vm8, %v1001_v63 }
0x158c   :  { %v2736_v47 = vpop.eup %2735 }
0x158d   :  { %1106 = vrot.lane.b32.xlu0 %v2736_v47, %s2803_s14 }
0x1591   :  { %560 = vrot.lane.b32.xlu0 %v3004_v27, %s2804_s5  ;;  %v1118_v27 = vld [vmem:[%s3348_s6 + $0x8] sm:$0xff] }
0x1592   :  { %2540 = vmatprep.subr.mxu0 %v1118_v27 }
0x1593   :  { %2541 = vmatpush3.msra.mxu0 %v1118_v27 }
0x1594   :  { %2542 = vmatprep.subr.mxu0 %v1117_v14 }
0x1595   :  { %889 = vrot.lane.b32.xlu0 %v3058_v28, %s2804_s5  ;;  %2543 = vmatpush3.msra.mxu0 %v1117_v14 }
0x1596   :  { %2558 = vmatprep.subr.mxu0 %v2801_v8 }
0x15ff   :  { %v1107_v16 = vpop.permute.xlu0 %1106 }
0x1600   :  { %v1109_v11 = vmul.f32 %v2734_v61, %v1107_v16 }
0x1602   :  { %1111 = vrot.lane.b32.xlu0 %v1109_v11, %s2804_s5 }
0x1603   :  { %v561_v17 = vpop.permute.xlu0 %560 }
0x1604   :  { %564 = vst.msk [vmem:[#allocation2] sm:$0x30] %vm563_vm8, %v561_v17 }
0x1607   :  { %v890_v18 = vpop.permute.xlu0 %889 }
0x1608   :  { %892 = vst.msk [vmem:[#allocation2 + $0x8] sm:$0xc] %vm451_vm6, %v890_v18 }
0x160b   :  { %v1115_v12 = vld [vmem:[#allocation2] sm:$0xff] }
0x160c   :  { %2544 = vmatprep.mubr.msk.f32.mxu0 %vm154_vm4, %v1115_v12 }
0x1674   :  { %v1112_v19 = vpop.permute.xlu0 %1111 }
0x1675   :  { %1114 = vst.msk [vmem:[#allocation2 + $0x8] sm:$0xc0] %vm675_vm7, %v1112_v19 }
0x167c   :  { %v1116_v20 = vld [vmem:[#allocation2 + $0x8] sm:$0xff] }
0x167d   :  { %2545 = vmatmul.mubr.msk.f32.vlgmr.msra.gmra.mxu0 %vm154_vm4, %v1116_v20 }
0x167e   :  { %2559 = vmatpush3.msra.mxu0 %v3096_v9  ;;  %2566 = vmatprep.mubr.msk.f32.mxu0 %vm2802_vm1, %v2801_v8 }
0x167f   :  { %2560 = vmatprep.subr.mxu0 %v2801_v8 }
0x1680   :  { %2561 = vmatpush3.msra.mxu0 %v3104_v13 }
0x1681   :  { %2562 = vmatprep.subr.mxu0 %v2801_v8 }
0x1682   :  { %2563 = vmatpush3.msra.mxu0 %v3114_v10 }
0x1683   :  { %2564 = vmatprep.subr.mxu0 %v2801_v8 }
0x1684   :  { %2565 = vmatpush3.msra.mxu0 %v3123_v15 }
0x1685   :  { %2580 = vmatprep.subr.mxu0 %v2801_v8 }
0x173d   :  { %v2546_v25 = vpop.f32.mrf.mxu0 }
0x173e   :  { %v3158_v28 = vadd.f32 %v2546_v25, %v2300_v23 }
0x173f   :  { %v1200_v29 = vpop.f32.mrf.mxu0 }
0x1740   :  { %v3160_v30 = vadd.f32 %v2300_v23, %v1200_v29 }
0x1742   :  { %v1283_v31 = vadd.f32 %v1279_v21, %v3160_v30 }
0x1744   :  { %2737 = vtanh.f32 %v1283_v31  ;;  %v1284_v33 = vsub.f32 0.0, %v1283_v31 }
0x1746   :  { %v1285_v34 = vmul.f32 1.442695, %v1284_v33 }
0x1748   :  { %2739 = vpow2.f32 %v1285_v34 }
0x1751   :  { %v2738_v32 = vpop.eup %2737 }
0x1752   :  { %1293 = vrot.lane.b32.xlu1 %v2738_v32, %s2803_s14 }
0x1755   :  { %v2740_v35 = vpop.eup %2739 }
0x1756   :  { %v1287_v36 = vadd.f32 1.0, %v2740_v35 }
0x1758   :  { %2741 = vrcp.f32 %v1287_v36 }
0x1765   :  { %v2742_v37 = vpop.eup %2741 }
0x1766   :  { %v1291_v40 = vmul.f32 0.0, %v2742_v37 }
0x17c4   :  { %v1294_v38 = vpop.permute.xlu1 %1293 }
0x17c5   :  { %v1296_v39 = vmul.f32 %v2742_v37, %v1294_v38 }
0x17c7   :  { %1298 = vrot.lane.b32.xlu0 %v1296_v39, %s2803_s14 }
0x1839   :  { %v1299_v41 = vpop.permute.xlu0 %1298 }
0x183a   :  { %v1301_v42 = vadd.f32 %v1299_v41, %v1291_v40 }
0x183c   :  { %2743 = vtanh.f32 %v1301_v42  ;;  %v1397_v59 = vrot.slane %v1301_v42, 6 }
0x1849   :  { %v2744_v43 = vpop.eup %2743 }
0x184a   :  { %1304 = vrot.lane.b32.xlu1 %v2744_v43, %s2803_s14 }
0x18bc   :  { %v1305_v44 = vpop.permute.xlu1 %1304 }
0x18bd   :  { %v1307_v45 = vmul.f32 %v2742_v37, %v1305_v44 }
0x18bf   :  { %1309 = vrot.lane.b32.xlu0 %v1307_v45, %s2804_s5 }
0x1931   :  { %v1310_v26 = vpop.permute.xlu0 %1309 }
0x1932   :  { %1312 = vst.msk [vmem:[#allocation2] sm:$0x3] %vm342_vm5, %v1310_v26  ;;  %2567 = vmatmul.mubr.msk.f32.vlgmr.msra.gmra.mxu0 %vm154_vm4, %v1310_v26 }
0x1933   :  { %2581 = vmatpush3.msra.mxu0 %v3096_v9  ;;  %2588 = vmatprep.mubr.msk.f32.mxu0 %vm2802_vm1, %v2801_v8 }
0x1934   :  { %2582 = vmatprep.subr.mxu0 %v2801_v8 }
0x1935   :  { %2583 = vmatpush3.msra.mxu0 %v3104_v13 }
0x1936   :  { %2584 = vmatprep.subr.mxu0 %v2801_v8 }
0x1937   :  { %2585 = vmatpush3.msra.mxu0 %v3114_v10 }
0x1938   :  { %2586 = vmatprep.subr.mxu0 %v2801_v8 }
0x1939   :  { %2587 = vmatpush3.msra.mxu0 %v3123_v15 }
0x193a   :  { %2602 = vmatprep.subr.mxu0 %v2801_v8 }
0x19f2   :  { %v1381_v46 = vpop.f32.mrf.mxu0 }
0x19f3   :  { %v1386_v48 = vrot.slane %v1381_v46, 6 }
0x19f4   :  { %v2568_v49 = vpop.f32.mrf.mxu0 }
0x19f5   :  { %v1388_v50 = vadd.f32 %v1386_v48, %v3160_v30 }
0x19f7   :  { %2745 = vtanh.f32 %v1388_v50  ;;  %v1389_v52 = vsub.f32 0.0, %v1388_v50 }
0x19f9   :  { %v1390_v53 = vmul.f32 1.442695, %v1389_v52 }
0x19fb   :  { %2747 = vpow2.f32 %v1390_v53 }
0x1a04   :  { %v2746_v51 = vpop.eup %2745 }
0x1a05   :  { %1401 = vrot.lane.b32.xlu1 %v2746_v51, %s2803_s14 }
0x1a08   :  { %v2748_v54 = vpop.eup %2747 }
0x1a09   :  { %v1392_v55 = vadd.f32 1.0, %v2748_v54 }
0x1a0b   :  { %2749 = vrcp.f32 %v1392_v55 }
0x1a18   :  { %v2750_v56 = vpop.eup %2749 }
0x1a19   :  { %v1399_v60 = vmul.f32 %v2750_v56, %v1397_v59 }
0x1a77   :  { %v1402_v57 = vpop.permute.xlu1 %1401 }
0x1a78   :  { %v1404_v58 = vmul.f32 %v2750_v56, %v1402_v57 }
0x1a7a   :  { %1406 = vrot.lane.b32.xlu0 %v1404_v58, %s2803_s14 }
0x1aec   :  { %v1407_v61 = vpop.permute.xlu0 %1406 }
0x1aed   :  { %v1409_v62 = vadd.f32 %v1407_v61, %v1399_v60 }
0x1aef   :  { %2751 = vtanh.f32 %v1409_v62  ;;  %v1508_v12 = vrot.slane %v1409_v62, 6 }
0x1afc   :  { %v2752_v0 = vpop.eup %2751 }
0x1afd   :  { %1412 = vrot.lane.b32.xlu1 %v2752_v0, %s2803_s14 }
0x1b6f   :  { %v1413_v24 = vpop.permute.xlu1 %1412 }
0x1b70   :  { %v3183_v1 = vmul.f32 %v2750_v56, %v1413_v24 }
0x1b72   :  { %v1421_v2 = vrot.slane %v3183_v1, 2 }
0x1b74   :  { %1422 = vrot.lane.b32.xlu0 %v1421_v2, %s2804_s5 }
0x1be6   :  { %v1423_v3 = vpop.permute.xlu0 %1422 }
0x1be7   :  { %2578 = vmatmul.mubr.msk.f32.vlgmr.msra.gmra.mxu1 %vm154_vm4, %v1423_v3 }
0x1be8   :  { %2592 = vmatpush3.msra.mxu1 %v3096_v9  ;;  %2599 = vmatprep.mubr.msk.f32.mxu1 %vm2802_vm1, %v2801_v8 }
0x1be9   :  { %2593 = vmatprep.subr.mxu1 %v2801_v8 }
0x1bea   :  { %2594 = vmatpush3.msra.mxu1 %v3104_v13 }
0x1beb   :  { %2595 = vmatprep.subr.mxu1 %v2801_v8 }
0x1bec   :  { %2596 = vmatpush3.msra.mxu1 %v3114_v10 }
0x1bed   :  { %2597 = vmatprep.subr.mxu1 %v2801_v8 }
0x1bee   :  { %2598 = vmatpush3.msra.mxu1 %v3123_v15 }
0x1bef   :  { %2613 = vmatprep.subr.mxu1 %v2801_v8 }
0x1ca7   :  { %v1492_v4 = vpop.f32.mrf.mxu1 }
0x1ca8   :  { %v1497_v5 = vrot.slane %v1492_v4, 4 }
0x1ca9   :  { %v2579_v63 = vpop.f32.mrf.mxu1 }
0x1caa   :  { %v1499_v47 = vadd.f32 %v1497_v5, %v3160_v30 }
0x1cac   :  { %2753 = vtanh.f32 %v1499_v47  ;;  %v1500_v7 = vsub.f32 0.0, %v1499_v47 }
0x1cae   :  { %v1501_v27 = vmul.f32 1.442695, %v1500_v7 }
0x1cb0   :  { %2755 = vpow2.f32 %v1501_v27 }
0x1cb9   :  { %v2754_v6 = vpop.eup %2753 }
0x1cba   :  { %1512 = vrot.lane.b32.xlu1 %v2754_v6, %s2803_s14 }
0x1cbd   :  { %v2756_v14 = vpop.eup %2755 }
0x1cbe   :  { %v1503_v16 = vadd.f32 1.0, %v2756_v14 }
0x1cc0   :  { %2757 = vrcp.f32 %v1503_v16 }
0x1ccd   :  { %v2758_v11 = vpop.eup %2757 }
0x1cce   :  { %v1510_v19 = vmul.f32 %v2758_v11, %v1508_v12 }
0x1d2c   :  { %v1513_v17 = vpop.permute.xlu1 %1512 }
0x1d2d   :  { %v1515_v18 = vmul.f32 %v2758_v11, %v1513_v17 }
0x1d2f   :  { %1517 = vrot.lane.b32.xlu0 %v1515_v18, %s2803_s14 }
0x1da1   :  { %v1518_v20 = vpop.permute.xlu0 %1517 }
0x1da2   :  { %v1520_v21 = vadd.f32 %v1518_v20, %v1510_v19 }
0x1da4   :  { %2759 = vtanh.f32 %v1520_v21  ;;  %v1619_v44 = vrot.slane %v1520_v21, 6 }
0x1db1   :  { %v2760_v22 = vpop.eup %2759 }
0x1db2   :  { %1523 = vrot.lane.b32.xlu1 %v2760_v22, %s2803_s14 }
0x1e24   :  { %v1524_v23 = vpop.permute.xlu1 %1523 }
0x1e25   :  { %v3202_v25 = vmul.f32 %v2758_v11, %v1524_v23 }
0x1e27   :  { %v1532_v29 = vrot.slane %v3202_v25, 4 }
0x1e29   :  { %1533 = vrot.lane.b32.xlu0 %v1532_v29, %s2804_s5 }
0x1e9b   :  { %v1534_v31 = vpop.permute.xlu0 %1533 }
0x1e9c   :  { %2589 = vmatmul.mubr.msk.f32.vlgmr.msra.gmra.mxu0 %vm154_vm4, %v1534_v31 }
0x1e9d   :  { %2603 = vmatpush3.msra.mxu0 %v3096_v9  ;;  %2610 = vmatprep.mubr.msk.f32.mxu0 %vm2802_vm1, %v2801_v8 }
0x1e9e   :  { %2604 = vmatprep.subr.mxu0 %v2801_v8 }
0x1e9f   :  { %2605 = vmatpush3.msra.mxu0 %v3104_v13 }
0x1ea0   :  { %2606 = vmatprep.subr.mxu0 %v2801_v8 }
0x1ea1   :  { %2607 = vmatpush3.msra.mxu0 %v3114_v10 }
0x1ea2   :  { %2608 = vmatprep.subr.mxu0 %v2801_v8 }
0x1ea3   :  { %2609 = vmatpush3.msra.mxu0 %v3123_v15 }
0x1ea4   :  { %2624 = vmatprep.subr.mxu0 %v2801_v8 }
0x1f5c   :  { %v1603_v32 = vpop.f32.mrf.mxu0 }
0x1f5d   :  { %v1608_v33 = vrot.slane %v1603_v32, 2 }
0x1f5e   :  { %v2590_v34 = vpop.f32.mrf.mxu0 }
0x1f5f   :  { %v1610_v35 = vadd.f32 %v1608_v33, %v3160_v30 }
0x1f61   :  { %2761 = vtanh.f32 %v1610_v35  ;;  %v1611_v37 = vsub.f32 0.0, %v1610_v35 }
0x1f63   :  { %v1612_v38 = vmul.f32 1.442695, %v1611_v37 }
0x1f65   :  { %2763 = vpow2.f32 %v1612_v38 }
0x1f6e   :  { %v2762_v36 = vpop.eup %2761 }
0x1f6f   :  { %1623 = vrot.lane.b32.xlu1 %v2762_v36, %s2803_s14 }
0x1f72   :  { %v2764_v39 = vpop.eup %2763 }
0x1f73   :  { %v1614_v40 = vadd.f32 1.0, %v2764_v39 }
0x1f75   :  { %2765 = vrcp.f32 %v1614_v40 }
0x1f82   :  { %v2766_v41 = vpop.eup %2765 }
0x1f83   :  { %v1621_v45 = vmul.f32 %v2766_v41, %v1619_v44 }
0x1fe1   :  { %v1624_v42 = vpop.permute.xlu1 %1623 }
0x1fe2   :  { %v1626_v43 = vmul.f32 %v2766_v41, %v1624_v42 }
0x1fe4   :  { %1628 = vrot.lane.b32.xlu0 %v1626_v43, %s2803_s14 }
0x2056   :  { %v1629_v26 = vpop.permute.xlu0 %1628 }
0x2057   :  { %v1631_v46 = vadd.f32 %v1629_v26, %v1621_v45 }
0x2059   :  { %2767 = vtanh.f32 %v1631_v46  ;;  %v1727_v0 = vrot.slane %v1631_v46, 6 }
0x2066   :  { %v2768_v30 = vpop.eup %2767 }
0x2067   :  { %1634 = vrot.lane.b32.xlu1 %v2768_v30, %s2803_s14 }
0x20d9   :  { %v1635_v48 = vpop.permute.xlu1 %1634 }
0x20da   :  { %v3221_v49 = vmul.f32 %v2766_v41, %v1635_v48 }
0x20dc   :  { %v1643_v50 = vrot.slane %v3221_v49, 6 }
0x20de   :  { %1644 = vrot.lane.b32.xlu0 %v1643_v50, %s2804_s5 }
0x2150   :  { %v1645_v51 = vpop.permute.xlu0 %1644 }
0x2151   :  { %2600 = vmatmul.mubr.msk.f32.vlgmr.msra.gmra.mxu1 %vm154_vm4, %v1645_v51 }
0x2152   :  { %2614 = vmatpush3.msra.mxu1 %v3096_v9  ;;  %2621 = vmatprep.mubr.msk.f32.mxu1 %vm2802_vm1, %v2801_v8 }
0x2153   :  { %2615 = vmatprep.subr.mxu1 %v2801_v8 }
0x2154   :  { %2616 = vmatpush3.msra.mxu1 %v3104_v13 }
0x2155   :  { %2617 = vmatprep.subr.mxu1 %v2801_v8 }
0x2156   :  { %2618 = vmatpush3.msra.mxu1 %v3114_v10 }
0x2157   :  { %2619 = vmatprep.subr.mxu1 %v2801_v8 }
0x2158   :  { %2620 = vmatpush3.msra.mxu1 %v3123_v15 }
0x2211   :  { %v1714_v52 = vpop.f32.mrf.mxu1 }
0x2212   :  { %v1718_v53 = vadd.f32 %v1714_v52, %v3158_v28 }
0x2213   :  { %v2601_v54 = vpop.f32.mrf.mxu1 }
0x2214   :  { %2769 = vtanh.f32 %v1718_v53  ;;  %v1719_v56 = vsub.f32 0.0, %v1718_v53 }
0x2216   :  { %v1720_v57 = vmul.f32 1.442695, %v1719_v56 }
0x2218   :  { %2771 = vpow2.f32 %v1720_v57 }
0x2221   :  { %v2770_v55 = vpop.eup %2769 }
0x2222   :  { %1731 = vrot.lane.b32.xlu1 %v2770_v55, %s2803_s14 }
0x2225   :  { %v2772_v58 = vpop.eup %2771 }
0x2226   :  { %v1722_v59 = vadd.f32 1.0, %v2772_v58 }
0x2228   :  { %2773 = vrcp.f32 %v1722_v59 }
0x2235   :  { %v2774_v60 = vpop.eup %2773 }
0x2236   :  { %v1729_v24 = vmul.f32 %v2774_v60, %v1727_v0 }
0x2294   :  { %v1732_v61 = vpop.permute.xlu1 %1731 }
0x2295   :  { %v1734_v62 = vmul.f32 %v2774_v60, %v1732_v61 }
0x2297   :  { %1736 = vrot.lane.b32.xlu0 %v1734_v62, %s2803_s14 }
0x2309   :  { %v1737_v2 = vpop.permute.xlu0 %1736 }
0x230a   :  { %v1739_v3 = vadd.f32 %v1737_v2, %v1729_v24 }
0x230c   :  { %2775 = vtanh.f32 %v1739_v3 }
0x2319   :  { %v2776_v4 = vpop.eup %2775 }
0x231a   :  { %1742 = vrot.lane.b32.xlu1 %v2776_v4, %s2803_s14 }
0x238c   :  { %v1743_v5 = vpop.permute.xlu1 %1742 }
0x238d   :  { %v1745_v63 = vmul.f32 %v2774_v60, %v1743_v5 }
0x238f   :  { %1747 = vrot.lane.b32.xlu0 %v1745_v63, %s2804_s5 }
0x2401   :  { %v1748_v47 = vpop.permute.xlu0 %1747 }
0x2402   :  { %1750 = vst.msk [vmem:[#allocation2 + $0x8] sm:$0x3] %vm342_vm5, %v1748_v47  ;;  %2611 = vmatmul.mubr.msk.f32.vlgmr.msra.gmra.mxu0 %vm154_vm4, %v1748_v47 }
0x2403   :  { %2625 = vmatpush3.msra.mxu0 %v3096_v9  ;;  %2632 = vmatprep.mubr.msk.f32.mxu0 %vm2802_vm1, %v2801_v8 }
0x2404   :  { %2626 = vmatprep.subr.mxu0 %v2801_v8 }
0x2405   :  { %2627 = vmatpush3.msra.mxu0 %v3104_v13 }
0x2406   :  { %2628 = vmatprep.subr.mxu0 %v2801_v8 }
0x2407   :  { %2629 = vmatpush3.msra.mxu0 %v3114_v10 }
0x2408   :  { %2630 = vmatprep.subr.mxu0 %v2801_v8 }
0x2409   :  { %2631 = vmatpush3.msra.mxu0 %v3123_v15  ;;  %v1835_v15 = vrot.slane %v1739_v3, 6 }
0x24c2   :  { %v1819_v6 = vpop.f32.mrf.mxu0 }
0x24c3   :  { %v1824_v7 = vrot.slane %v1819_v6, 6  ;;  %v2085_v6 = vld [vmem:[%s3351_s9 + $0x10] sm:$0xff] }
0x24c4   :  { %v2612_v27 = vpop.f32.mrf.mxu0 }
0x24c5   :  { %v1826_v9 = vadd.f32 %v1824_v7, %v3158_v28  ;;  %v2084_v7 = vld [vmem:[%s3351_s9 + $0x8] sm:$0xff] }
0x24c6   :  { %v2190_v27 = vld [vmem:[%s3352_s11 + $0x48] sm:$0xff] }
0x24c7   :  { %2777 = vtanh.f32 %v1826_v9  ;;  %v1827_v16 = vsub.f32 0.0, %v1826_v9  ;;  %v2189_v9 = vld [vmem:[%s3352_s11 + $0x40] sm:$0xff]  ;;  %2646 = vmatprep.subr.mxu0 %v2190_v27 }
0x24c9   :  { %v1828_v11 = vmul.f32 1.442695, %v1827_v16 }
0x24cb   :  { %2779 = vpow2.f32 %v1828_v11  ;;  %v2188_v11 = vld [vmem:[%s3352_s11 + $0x38] sm:$0xff] }
0x24d4   :  { %v2778_v14 = vpop.eup %2777 }
0x24d5   :  { %1839 = vrot.lane.b32.xlu1 %v2778_v14, %s2803_s14 }
0x24d8   :  { %v2780_v13 = vpop.eup %2779 }
0x24d9   :  { %v1830_v17 = vadd.f32 1.0, %v2780_v13  ;;  %v2187_v13 = vld [vmem:[%s3352_s11 + $0x30] sm:$0xff] }
0x24db   :  { %2781 = vrcp.f32 %v1830_v17 }
0x24e8   :  { %v2782_v10 = vpop.eup %2781 }
0x24e9   :  { %v1837_v12 = vmul.f32 %v2782_v10, %v1835_v15 }
0x2547   :  { %v1840_v18 = vpop.permute.xlu1 %1839 }
0x2548   :  { %v1842_v8 = vmul.f32 %v2782_v10, %v1840_v18  ;;  %v2185_v18 = vld [vmem:[%s3352_s11 + $0x20] sm:$0xff] }
0x254a   :  { %1844 = vrot.lane.b32.xlu0 %v1842_v8, %s2803_s14 }
0x25bc   :  { %v1845_v19 = vpop.permute.xlu0 %1844 }
0x25bd   :  { %v1847_v20 = vadd.f32 %v1845_v19, %v1837_v12 }
0x25bf   :  { %2783 = vtanh.f32 %v1847_v20  ;;  %v1946_v44 = vrot.slane %v1847_v20, 6  ;;  %v2184_v20 = vld [vmem:[%s3352_s11 + $0x18] sm:$0xff] }
0x25cc   :  { %v2784_v21 = vpop.eup %2783 }
0x25cd   :  { %1850 = vrot.lane.b32.xlu1 %v2784_v21, %s2803_s14  ;;  %v2183_v21 = vld [vmem:[%s3352_s11 + $0x10] sm:$0xff] }
0x263f   :  { %v1851_v22 = vpop.permute.xlu1 %1850 }
0x2640   :  { %v3255_v23 = vmul.f32 %v2782_v10, %v1851_v22  ;;  %v2186_v10 = vld [vmem:[%s3352_s11 + $0x28] sm:$0xff] }
0x2641   :  { %v2182_v22 = vld [vmem:[%s3352_s11 + $0x8] sm:$0xff] }
0x2642   :  { %v1859_v29 = vrot.slane %v3255_v23, 2 }
0x2644   :  { %1860 = vrot.lane.b32.xlu0 %v1859_v29, %s2804_s5  ;;  %v2310_v29 = vld [vmem:[%s3353_s10] ss:$0 sm:$0xff] }
0x26b6   :  { %v1861_v31 = vpop.permute.xlu0 %1860 }
0x26b7   :  { %2622 = vmatmul.mubr.msk.f32.vlgmr.msra.gmra.mxu1 %vm154_vm4, %v1861_v31 }
0x2777   :  { %v1930_v32 = vpop.f32.mrf.mxu1 }
0x2778   :  { %v1935_v33 = vrot.slane %v1930_v32, 4 }
0x2779   :  { %v2623_v34 = vpop.f32.mrf.mxu1 }
0x277a   :  { %v1937_v35 = vadd.f32 %v1935_v33, %v3158_v28 }
0x277c   :  { %2785 = vtanh.f32 %v1937_v35  ;;  %v1938_v37 = vsub.f32 0.0, %v1937_v35 }
0x277e   :  { %v1939_v38 = vmul.f32 1.442695, %v1938_v37 }
0x2780   :  { %2787 = vpow2.f32 %v1939_v38 }
0x2789   :  { %v2786_v36 = vpop.eup %2785 }
0x278a   :  { %1950 = vrot.lane.b32.xlu1 %v2786_v36, %s2803_s14 }
0x278d   :  { %v2788_v39 = vpop.eup %2787 }
0x278e   :  { %v1941_v40 = vadd.f32 1.0, %v2788_v39  ;;  %v2313_v39 = vld [vmem:[%s3354_s12] ss:$0 sm:$0xff] }
0x2790   :  { %2789 = vrcp.f32 %v1941_v40 }
0x279d   :  { %v2790_v41 = vpop.eup %2789 }
0x279e   :  { %v1948_v45 = vmul.f32 %v2790_v41, %v1946_v44 }
0x27fc   :  { %v1951_v42 = vpop.permute.xlu1 %1950 }
0x27fd   :  { %v1953_v43 = vmul.f32 %v2790_v41, %v1951_v42 }
0x27ff   :  { %1955 = vrot.lane.b32.xlu0 %v1953_v43, %s2803_s14 }
0x2871   :  { %v1956_v26 = vpop.permute.xlu0 %1955 }
0x2872   :  { %v1958_v46 = vadd.f32 %v1956_v26, %v1948_v45 }
0x2874   :  { %2791 = vtanh.f32 %v1958_v46 }
0x2881   :  { %v2792_v30 = vpop.eup %2791 }
0x2882   :  { %1961 = vrot.lane.b32.xlu1 %v2792_v30, %s2803_s14 }
0x28f4   :  { %v1962_v48 = vpop.permute.xlu1 %1961 }
0x28f5   :  { %v1964_v50 = vmul.f32 %v2790_v41, %v1962_v48 }
0x28f7   :  { %v1970_v51 = vrot.slane %v1964_v50, 4 }
0x28f9   :  { %1971 = vrot.lane.b32.xlu0 %v1970_v51, %s2804_s5 }
0x296b   :  { %v1972_v52 = vpop.permute.xlu0 %1971 }
0x296c   :  { %2633 = vmatmul.mubr.msk.f32.vlgmr.msra.gmra.mxu0 %vm154_vm4, %v1972_v52 }
0x296d   :  { %2647 = vmatpush3.msra.mxu0 %v2190_v27 }
0x296e   :  { %2648 = vmatprep.subr.mxu0 %v2189_v9 }
0x296f   :  { %2649 = vmatpush3.msra.mxu0 %v2189_v9 }
0x2970   :  { %2650 = vmatprep.subr.mxu0 %v2188_v11 }
0x2971   :  { %2651 = vmatpush3.msra.mxu0 %v2188_v11 }
0x2972   :  { %2652 = vmatprep.subr.mxu0 %v2187_v13 }
0x2973   :  { %2653 = vmatpush3.msra.mxu0 %v2187_v13 }
0x2974   :  { %2654 = vmatprep.subr.mxu0 %v2186_v10 }
0x2975   :  { %2655 = vmatpush3.msra.mxu0 %v2186_v10 }
0x2976   :  { %2656 = vmatprep.subr.mxu0 %v2185_v18 }
0x2977   :  { %2657 = vmatpush3.msra.mxu0 %v2185_v18 }
0x2978   :  { %2658 = vmatprep.subr.mxu0 %v2184_v20 }
0x2979   :  { %2659 = vmatpush3.msra.mxu0 %v2184_v20 }
0x297a   :  { %2660 = vmatprep.subr.mxu0 %v2183_v21 }
0x297b   :  { %2661 = vmatpush3.msra.mxu0 %v2183_v21 }
0x297c   :  { %2662 = vmatprep.subr.mxu0 %v2182_v22 }
0x297d   :  { %2663 = vmatpush3.msra.mxu0 %v2182_v22 }
0x2a2c   :  { %v2041_v53 = vpop.f32.mrf.mxu0 }
0x2a2d   :  { %v2046_v54 = vrot.slane %v2041_v53, 2 }
0x2a2e   :  { %v2634_v55 = vpop.f32.mrf.mxu0 }
0x2a2f   :  { %v2048_v56 = vadd.f32 %v2046_v54, %v3158_v28  ;;  %v2057_v28 = vrot.slane %v1958_v46, 6 }
0x2a31   :  { %2793 = vtanh.f32 %v2048_v56  ;;  %v2049_v58 = vsub.f32 0.0, %v2048_v56 }
0x2a33   :  { %v2050_v59 = vmul.f32 1.442695, %v2049_v58 }
0x2a35   :  { %2795 = vpow2.f32 %v2050_v59 }
0x2a3e   :  { %v2794_v57 = vpop.eup %2793 }
0x2a3f   :  { %2061 = vrot.lane.b32.xlu1 %v2794_v57, %s2803_s14 }
0x2a42   :  { %v2796_v60 = vpop.eup %2795 }
0x2a43   :  { %v2052_v61 = vadd.f32 1.0, %v2796_v60 }
0x2a45   :  { %2797 = vrcp.f32 %v2052_v61 }
0x2a52   :  { %v2798_v62 = vpop.eup %2797 }
0x2a53   :  { %v2059_v2 = vmul.f32 %v2798_v62, %v2057_v28 }
0x2ab1   :  { %v2062_v0 = vpop.permute.xlu1 %2061 }
0x2ab2   :  { %v2064_v24 = vmul.f32 %v2798_v62, %v2062_v0 }
0x2ab4   :  { %2066 = vrot.lane.b32.xlu0 %v2064_v24, %s2803_s14 }
0x2ab8   :  { %1417 = vrot.lane.b32.xlu0 %v3183_v1, %s2804_s5 }
0x2abc   :  { %1639 = vrot.lane.b32.xlu0 %v3221_v49, %s2804_s5  ;;  %v2086_v49 = vld [vmem:[%s3351_s9 + $0x18] sm:$0xff] }
0x2abd   :  { %2635 = vmatprep.subr.mxu1 %v2086_v49 }
0x2abe   :  { %2636 = vmatpush3.msra.mxu1 %v2086_v49 }
0x2abf   :  { %2637 = vmatprep.subr.mxu1 %v2085_v6 }
0x2ac0   :  { %1966 = vrot.lane.b32.xlu0 %v1964_v50, %s2804_s5  ;;  %2638 = vmatpush3.msra.mxu1 %v2085_v6 }
0x2ac1   :  { %2639 = vmatprep.subr.mxu1 %v2084_v7 }
0x2ac2   :  { %2640 = vmatpush3.msra.mxu1 %v2084_v7 }
0x2b26   :  { %v2067_v3 = vpop.permute.xlu0 %2066 }
0x2b27   :  { %v2069_v4 = vadd.f32 %v2067_v3, %v2059_v2 }
0x2b29   :  { %2799 = vtanh.f32 %v2069_v4 }
0x2b2a   :  { %v1418_v5 = vpop.permute.xlu0 %1417 }
0x2b2b   :  { %1420 = vst.msk [vmem:[#allocation2] sm:$0xc] %vm451_vm6, %v1418_v5 }
0x2b2e   :  { %v1640_v63 = vpop.permute.xlu0 %1639 }
0x2b2f   :  { %1642 = vst.msk [vmem:[#allocation2] sm:$0xc0] %vm675_vm7, %v1640_v63 }
0x2b32   :  { %v1967_v47 = vpop.permute.xlu0 %1966 }
0x2b33   :  { %1969 = vst.msk [vmem:[#allocation2 + $0x8] sm:$0x30] %vm563_vm8, %v1967_v47 }
0x2b36   :  { %v2800_v1 = vpop.eup %2799 }
0x2b37   :  { %2072 = vrot.lane.b32.xlu1 %v2800_v1, %s2803_s14 }
0x2b3b   :  { %1528 = vrot.lane.b32.xlu1 %v3202_v25, %s2804_s5  ;;  %v2083_v25 = vld [vmem:[%s3351_s9] sm:$0xff] }
0x2b3c   :  { %2641 = vmatprep.subr.mxu1 %v2083_v25 }
0x2b3d   :  { %2642 = vmatpush3.msra.mxu1 %v2083_v25 }
0x2b3f   :  { %1855 = vrot.lane.b32.xlu1 %v3255_v23, %s2804_s5  ;;  %v2181_v23 = vld [vmem:[%s3352_s11] sm:$0xff] }
0x2b40   :  { %2664 = vmatprep.subr.mxu0 %v2181_v23 }
0x2b41   :  { %2665 = vmatpush3.msra.mxu0 %v2181_v23 }
0x2ba9   :  { %v2073_v14 = vpop.permute.xlu1 %2072 }
0x2baa   :  { %v2075_v16 = vmul.f32 %v2798_v62, %v2073_v14 }
0x2bac   :  { %2077 = vrot.lane.b32.xlu1 %v2075_v16, %s2804_s5 }
0x2bad   :  { %v1529_v17 = vpop.permute.xlu1 %1528 }
0x2bae   :  { %1531 = vst.msk [vmem:[#allocation2] sm:$0x30] %vm563_vm8, %v1529_v17 }
0x2bb1   :  { %v1856_v8 = vpop.permute.xlu1 %1855 }
0x2bb2   :  { %1858 = vst.msk [vmem:[#allocation2 + $0x8] sm:$0xc] %vm451_vm6, %v1856_v8 }
0x2bb5   :  { %v2081_v15 = vld [vmem:[#allocation2] sm:$0xff] }
0x2bb6   :  { %2643 = vmatprep.mubr.msk.f32.mxu1 %vm154_vm4, %v2081_v15 }
0x2c1e   :  { %v2078_v12 = vpop.permute.xlu1 %2077 }
0x2c1f   :  { %2080 = vst.msk [vmem:[#allocation2 + $0x8] sm:$0xc0] %vm675_vm7, %v2078_v12 }
0x2c26   :  { %v2082_v19 = vld [vmem:[#allocation2 + $0x8] sm:$0xff] }
0x2c27   :  { %2644 = vmatmul.mubr.msk.f32.vlgmr.msra.gmra.mxu1 %vm154_vm4, %v2082_v19 }
0x2ce7   :  { %v2645_v31 = vpop.f32.mrf.mxu1 }
0x2ce8   :  { %v2172_v32 = vadd.f32 %v2645_v31, %v2310_v29 }
0x2ce9   :  { %v2166_v33 = vpop.f32.mrf.mxu1 }
0x2cea   :  { %v2167_v34 = vadd.f32 %v2310_v29, %v2166_v33  ;;  %v2178_v35 = vmul.f32 0.01, %v2172_v32  ;;  %vm2176_vm9 = vcmp.gt.f32.partialorder %v2172_v32, 0.0 }
0x2cec   :  { %vm2175_vm10 = vcmp.gt.f32.partialorder %v2167_v34, 0.0  ;;  %v2177_v36 = vmul.f32 0.01, %v2167_v34  ;;  %v2180_v38 = vsel %vm2176_vm9, %v2172_v32, %v2178_v35 }
0x2cee   :  { %v2179_v37 = vsel %vm2175_vm10, %v2167_v34, %v2177_v36 }
0x2cef   :  { %2666 = vmatprep.mubr.msk.f32.mxu0 %vm2198_vm11, %v2179_v37 }
0x2cf0   :  { %2667 = vmatmul.mubr.msk.f32.vlgmr.msra.gmra.mxu0 %vm2198_vm11, %v2180_v38 }
0x2db0   :  { %v2668_v40 = vpop.f32.mrf.mxu0 }
0x2db1   :  { %v2277_v41 = vadd.f32 %v2668_v40, %v2313_v39 }
0x2db2   :  { %v2271_v42 = vpop.f32.mrf.mxu0 }
0x2db3   :  { %2282 = vst.msk [vmem:[%s3355_s13 + $0x8] sm:$0xff] %vm2280_vm12, %v2277_v41  ;;  %v2272_v43 = vadd.f32 %v2313_v39, %v2271_v42 }
0x2db5   :  { %2281 = vst.msk [vmem:[%s3355_s13] sm:$0xff] %vm2280_vm12, %v2272_v43 }

</bundles_post_ra>
